<compile_context>
chip_gen: v5e
topology: v5e:2x2
jax: 0.10.0
libtpu: 0.0.40
codegen_flags: <defaults>
</compile_context>

<pallas_src>
import jax
import jax.numpy as jnp
from jax.experimental import pallas as pl
from jax.experimental.pallas import tpu as pltpu

HIDDEN = 512
# Use the fully-resident (single-grid-step) path while the bf16 hidden-weight
# stack fits comfortably in VMEM (24 MiB => layer_num <= 48).
_RESIDENT_WEIGHT_BUDGET_BYTES = 24 * 1024 * 1024
_RESIDENT_VMEM_LIMIT_BYTES = 48 * 1024 * 1024   # < 64 MiB physical on v7x
_MAX_BATCH_TILE = 256                            # rows per batch tile (MXU-friendly)


# ----------------------------------------------------------------------------
# Kernels
# ----------------------------------------------------------------------------
def _make_resident_kernel(layer_num: int):
    """Whole MLP in one grid step; all weights + bias table VMEM-resident.

    Refs (layer_num > 0):  x(TB,K_pad f32), w0(K_pad,512 bf16), b(L+1,512 f32),
                           wh(L,512,512 bf16), o(TB,512 f32)
    Refs (layer_num == 0): x, w0, b, o   (no dummy hidden weights are DMA'd)
    """
    def kernel(x_ref, w0_ref, b_ref, *rest):
        if layer_num > 0:
            wh_ref, o_ref = rest
        else:
            (o_ref,) = rest

        # Layer 0: cast activation operand to bf16, accumulate in f32.
        y = jnp.dot(x_ref[...].astype(jnp.bfloat16), w0_ref[...],
                    preferred_element_type=jnp.float32)
        act = jnp.maximum(y + b_ref[pl.ds(0, 1), :], 0.0)      # bias+ReLU in f32

        # Static (trace-time) layer loop over resident bf16 weights.
        for i in range(layer_num):
            y = jnp.dot(act.astype(jnp.bfloat16), wh_ref[i],
                        preferred_element_type=jnp.float32)
            act = jnp.maximum(y + b_ref[pl.ds(i + 1, 1), :], 0.0)

        o_ref[...] = act
    return kernel


def _streamed_kernel(x_ref, w0_ref, b_ref, wh_ref, o_ref):
    """Fallback for large layer_num: one grid step per layer, weights streamed.

    x_ref:  (B_pad, K_pad) f32      resident (block index constant)
    w0_ref: (K_pad, 512)   bf16     resident
    b_ref:  (L+1, 512)     f32      resident bias table
    wh_ref: (512, 512)     bf16     layer l-1's weight (Squeezed leading dim,
                                    double-buffered by the Pallas pipeline)
    o_ref:  (B_pad, 512)   f32      output block, VMEM-resident across the
                                    layer axis -> doubles as the activation
    """
    l = pl.program_id(0)

    @pl.when(l == 0)
    def _():
        y = jnp.dot(x_ref[...].astype(jnp.bfloat16), w0_ref[...],
                    preferred_element_type=jnp.float32)
        o_ref[...] = jnp.maximum(y + b_ref[pl.ds(0, 1), :], 0.0)

    @pl.when(l > 0)
    def _():
        y = jnp.dot(o_ref[...].astype(jnp.bfloat16), wh_ref[...],
                    preferred_element_type=jnp.float32)
        o_ref[...] = jnp.maximum(y + b_ref[pl.ds(l, 1), :], 0.0)


# ----------------------------------------------------------------------------
# Parameter construction / packing
# ----------------------------------------------------------------------------
def init_net_params(key, layer_num: int, state_num: int = 115):
    """Deterministic init mimicking torch.nn.Linear defaults (f32 master copy).

    Weights are stored transposed relative to torch: (in_features, out_features),
    so the kernel computes y = x @ W + b directly on the MXU.
    """
    params = {"first": None, "hidden": []}
    key, kw, kb = jax.random.split(key, 3)
    bound = 1.0 / jnp.sqrt(jnp.float32(state_num))
    w = jax.random.uniform(kw, (state_num, HIDDEN), jnp.float32, -bound, bound)
    b = jax.random.uniform(kb, (HIDDEN,), jnp.float32, -bound, bound)
    params["first"] = (w, b)
    for _ in range(layer_num):
        key, kw, kb = jax.random.split(key, 3)
        bound = 1.0 / jnp.sqrt(jnp.float32(HIDDEN))
        w = jax.random.uniform(kw, (HIDDEN, HIDDEN), jnp.float32, -bound, bound)
        b = jax.random.uniform(kb, (HIDDEN,), jnp.float32, -bound, bound)
        params["hidden"].append((w, b))
    return params
    # TODO(synk): orthogonal init option of the torch module is init-time only
    # and does not affect the forward pass implemented here.


def pack_params(params):
    """One-time packing for the kernel:
       * first-layer K zero-padded to a multiple of 128, weight cast to bf16,
       * hidden weights stacked to (L, 512, 512) bf16,
       * all biases folded into one (L+1, 512) f32 table."""
    w0, b0 = params["first"]
    K, H = w0.shape
    K_pad = ((K + 127) // 128) * 128
    w0p = jnp.pad(w0, ((0, K_pad - K), (0, 0))).astype(jnp.bfloat16)
    hidden = params["hidden"]
    bias = jnp.stack([b0] + [b for _, b in hidden]).astype(jnp.float32)  # (L+1, 512)
    wh = (jnp.stack([w for w, _ in hidden]).astype(jnp.bfloat16)
          if hidden else None)                                           # (L, 512, 512)
    return {"w0": w0p, "bias": bias, "wh": wh, "k": K, "layer_num": len(hidden)}


# ----------------------------------------------------------------------------
# Forward pass
# ----------------------------------------------------------------------------
def _forward_resident(packed, x, B_pad, K_pad, H, L):
    # Tile the batch; weights stay resident so they are never re-streamed per
    # batch tile, and the batch axis is "parallel" (v7x: both TensorCores).
    TB = B_pad if B_pad <= _MAX_BATCH_TILE else _MAX_BATCH_TILE
    Bp = ((B_pad + TB - 1) // TB) * TB
    if Bp != B_pad:
        x = jnp.pad(x, ((0, Bp - B_pad), (0, 0)))

    in_specs = [
        pl.BlockSpec((TB, K_pad), lambda i: (i, 0)),        # x tile (per batch tile)
        pl.BlockSpec((K_pad, H), lambda i: (0, 0)),         # w0 (resident)
        pl.BlockSpec((L + 1, H), lambda i: (0, 0)),         # bias table (resident)
    ]
    args = [x, packed["w0"], packed["bias"]]
    if L > 0:
        in_specs.append(pl.BlockSpec((L, H, H), lambda i: (0, 0, 0)))  # wh (resident)
        args.append(packed["wh"])

    flops = 2 * Bp * K_pad * H + 2 * L * Bp * H * H
    bytes_accessed = int(x.size * 4 + packed["w0"].size * 2
                         + (packed["wh"].size * 2 if L > 0 else 0)
                         + packed["bias"].size * 4 + Bp * H * 4)

    out = pl.pallas_call(
        _make_resident_kernel(L),
        out_shape=jax.ShapeDtypeStruct((Bp, H), jnp.float32),
        grid=(Bp // TB,),
        in_specs=in_specs,
        out_specs=pl.BlockSpec((TB, H), lambda i: (i, 0)),
        compiler_params=pltpu.CompilerParams(
            dimension_semantics=("parallel",),
            vmem_limit_bytes=_RESIDENT_VMEM_LIMIT_BYTES),
        cost_estimate=pl.CostEstimate(flops=flops, transcendentals=0,
                                      bytes_accessed=bytes_accessed),
    )(*args)
    return out[:B_pad]


def _forward_streamed(packed, x, B_pad, K_pad, H, L):
    # One grid step per layer; hidden weight tile double-buffered by Pallas.
    hidden_idx = lambda l: (jnp.maximum(l - 1, 0), 0, 0)
    flops = 2 * B_pad * K_pad * H + 2 * L * B_pad * H * H
    bytes_accessed = int(x.size * 4 + packed["w0"].size * 2
                         + packed["wh"].size * 2
                         + packed["bias"].size * 4 + B_pad * H * 4)

    return pl.pallas_call(
        _streamed_kernel,
        out_shape=jax.ShapeDtypeStruct((B_pad, H), jnp.float32),
        grid=(L + 1,),
        in_specs=[
            pl.BlockSpec((B_pad, K_pad), lambda l: (0, 0)),            # x (resident)
            pl.BlockSpec((K_pad, H), lambda l: (0, 0)),                # w0 (resident)
            pl.BlockSpec((L + 1, H), lambda l: (0, 0)),                # bias table
            pl.BlockSpec((pl.Squeezed(), H, H), hidden_idx),           # wh[l-1] streamed
        ],
        out_specs=pl.BlockSpec((B_pad, H), lambda l: (0, 0)),          # resident output
        compiler_params=pltpu.CompilerParams(
            dimension_semantics=("arbitrary",)),                       # sequential layers
        cost_estimate=pl.CostEstimate(flops=flops, transcendentals=0,
                                      bytes_accessed=bytes_accessed),
    )(x, packed["w0"], packed["bias"], packed["wh"])


def net_forward(packed, s, force_streamed: bool = False):
    """Pallas-backed forward pass of Net: returns (B, 512) float32."""
    s = jnp.asarray(s, jnp.float32)
    squeeze = s.ndim == 1
    if squeeze:
        s = s[None, :]
    B, K = s.shape
    assert K == packed["k"], (K, packed["k"])
    K_pad, H = packed["w0"].shape
    L = packed["layer_num"]

    # Pad batch to sublane multiple and K to lane multiple; padded zeros hit
    # zero-padded weight rows so the math is exact.  Extra rows sliced off.
    B_pad = max(8, ((B + 7) // 8) * 8)
    x = jnp.pad(s, ((0, B_pad - B), (0, K_pad - K)))

    wh = packed["wh"]
    hidden_bytes = 0 if wh is None else int(wh.size) * wh.dtype.itemsize
    use_streamed = (force_streamed and L > 0) or hidden_bytes > _RESIDENT_WEIGHT_BUDGET_BYTES

    if use_streamed:
        out = _forward_streamed(packed, x, B_pad, K_pad, H, L)
    else:
        out = _forward_resident(packed, x, B_pad, K_pad, H, L)

    out = out[:B]
    return out[0] if squeeze else out


# ----------------------------------------------------------------------------
# References (for correctness checking only)
# ----------------------------------------------------------------------------
def _reference_forward_f32(raw_params, s):
    """Pure-f32 JAX reference (matches the torch module semantics)."""
    x = jnp.asarray(s, jnp.float32)
    for w, b in [raw_params["first"]] + raw_params["hidden"]:
        x = jnp.maximum(x @ w + b, 0.0)
    return x


def _reference_forward_bf16(raw_params, s):
    """Reference matching the kernel's numerics: bf16 operands, f32 accumulate,
    bias+ReLU in f32."""
    x = jnp.asarray(s, jnp.float32)
    for w, b in [raw_params["first"]] + raw_params["hidden"]:
        y = jnp.dot(x.astype(jnp.bfloat16), w.astype(jnp.bfloat16),
                    preferred_element_type=jnp.float32)
        x = jnp.maximum(y + b, 0.0)
    return x


if __name__ == "__main__":
    key = jax.random.PRNGKey(0)

    layer_num = 2      # Net builds 1 + layer_num Linear+ReLU layers
    state_num = 115    # module default
    batch = 4

    key, k_params, k_s = jax.random.split(key, 3)
    raw = init_net_params(k_params, layer_num, state_num=state_num)
    packed = pack_params(raw)

    s = jax.random.normal(k_s, (batch, state_num), jnp.float32)

    ref_bf16 = _reference_forward_bf16(raw, s)
    ref_f32 = _reference_forward_f32(raw, s)

    # Resident (single-step, weights-in-VMEM) path — the default at this size.
    out = jax.block_until_ready(net_forward(packed, s))
    assert out.shape == (batch, HIDDEN), out.shape
    assert jnp.allclose(out, ref_bf16, atol=2e-3, rtol=2e-3), float(
        jnp.max(jnp.abs(out - ref_bf16)))
    assert jnp.allclose(out, ref_f32, atol=5e-2, rtol=5e-2), float(
        jnp.max(jnp.abs(out - ref_f32)))

    # Streamed (per-layer grid step) fallback path — exercised explicitly.
    out_s = jax.block_until_ready(net_forward(packed, s, force_streamed=True))
    assert out_s.shape == (batch, HIDDEN), out_s.shape
    assert jnp.allclose(out_s, ref_bf16, atol=2e-3, rtol=2e-3), float(
        jnp.max(jnp.abs(out_s - ref_bf16)))

    print("KERNEL_OK")
</pallas_src>

<mosaic_0001>
module attributes {stable_mosaic.version = 11 : i64} {
  func.func @kernel(%arg0: i32, %arg1: memref<8x128xf32, #tpu.memory_space<vmem>>, %arg2: memref<128x512xbf16, #tpu.memory_space<vmem>>, %arg3: memref<3x512xf32, #tpu.memory_space<vmem>>, %arg4: memref<2x512x512xbf16, #tpu.memory_space<vmem>>, %arg5: memref<8x512xf32, #tpu.memory_space<vmem>>) attributes {dimension_semantics = [#tpu.dimension_semantics<parallel>], iteration_bounds = array<i64: 1>, scalar_prefetch = 0 : i64, scratch_operands = 0 : i64, tpu.core_type = #tpu.core_type<tc>, window_params = [{transform_indices = @transform_0, window_bounds = array<i64: 8, 128>}, {pipeline_mode = #tpu.pipeline_mode<synchronous>, transform_indices = @transform_1, window_bounds = array<i64: 128, 512>}, {pipeline_mode = #tpu.pipeline_mode<synchronous>, transform_indices = @transform_2, window_bounds = array<i64: 3, 512>}, {pipeline_mode = #tpu.pipeline_mode<synchronous>, transform_indices = @transform_3, window_bounds = array<i64: 2, 512, 512>}, {transform_indices = @transform_4, window_bounds = array<i64: 8, 512>}]} {
    %c0 = arith.constant 0 : index
    %c0_0 = arith.constant 0 : index
    %0 = vector.load %arg1[%c0, %c0_0] : memref<8x128xf32, #tpu.memory_space<vmem>>, vector<8x128xf32>
    %1 = arith.truncf %0 : vector<8x128xf32> to vector<8x128xbf16>
    %c0_1 = arith.constant 0 : index
    %c0_2 = arith.constant 0 : index
    %2 = vector.load %arg2[%c0_1, %c0_2] : memref<128x512xbf16, #tpu.memory_space<vmem>>, vector<128x512xbf16>
    %cst = arith.constant dense<0.000000e+00> : vector<8x512xf32>
    %3 = tpu.matmul %1, %2, %cst {dimension_numbers = #tpu.dot_dimension_numbers<[1], [0], [0], [1], [0, 0, 1, 1], [], []>} : vector<8x128xbf16>, vector<128x512xbf16>, vector<8x512xf32> -> vector<8x512xf32>
    %c0_3 = arith.constant 0 : index
    %c0_4 = arith.constant 0 : index
    %4 = vector.load %arg3[%c0_3, %c0_4] : memref<3x512xf32, #tpu.memory_space<vmem>>, vector<1x512xf32>
    %5 = vector.broadcast %4 : vector<1x512xf32> to vector<8x512xf32>
    %6 = arith.addf %3, %5 : vector<8x512xf32>
    %cst_5 = arith.constant 0.000000e+00 : f32
    %7 = vector.broadcast %cst_5 : f32 to vector<8x512xf32>
    %8 = arith.maximumf %6, %7 : vector<8x512xf32>
    %9 = arith.truncf %8 : vector<8x512xf32> to vector<8x512xbf16>
    %c0_6 = arith.constant 0 : index
    %c0_7 = arith.constant 0 : index
    %c0_8 = arith.constant 0 : index
    %10 = vector.load %arg4[%c0_6, %c0_7, %c0_8] : memref<2x512x512xbf16, #tpu.memory_space<vmem>>, vector<1x512x512xbf16>
    %11 = vector.shape_cast %10 : vector<1x512x512xbf16> to vector<512x512xbf16>
    %cst_9 = arith.constant dense<0.000000e+00> : vector<8x512xf32>
    %12 = tpu.matmul %9, %11, %cst_9 {dimension_numbers = #tpu.dot_dimension_numbers<[1], [0], [0], [1], [0, 0, 1, 1], [], []>} : vector<8x512xbf16>, vector<512x512xbf16>, vector<8x512xf32> -> vector<8x512xf32>
    %c1 = arith.constant 1 : index
    %c0_10 = arith.constant 0 : index
    %13 = vector.load %arg3[%c1, %c0_10] : memref<3x512xf32, #tpu.memory_space<vmem>>, vector<1x512xf32>
    %14 = vector.broadcast %13 : vector<1x512xf32> to vector<8x512xf32>
    %15 = arith.addf %12, %14 : vector<8x512xf32>
    %cst_11 = arith.constant 0.000000e+00 : f32
    %16 = vector.broadcast %cst_11 : f32 to vector<8x512xf32>
    %17 = arith.maximumf %15, %16 : vector<8x512xf32>
    %18 = arith.truncf %17 : vector<8x512xf32> to vector<8x512xbf16>
    %c1_12 = arith.constant 1 : index
    %c0_13 = arith.constant 0 : index
    %c0_14 = arith.constant 0 : index
    %19 = vector.load %arg4[%c1_12, %c0_13, %c0_14] : memref<2x512x512xbf16, #tpu.memory_space<vmem>>, vector<1x512x512xbf16>
    %20 = vector.shape_cast %19 : vector<1x512x512xbf16> to vector<512x512xbf16>
    %cst_15 = arith.constant dense<0.000000e+00> : vector<8x512xf32>
    %21 = tpu.matmul %18, %20, %cst_15 {dimension_numbers = #tpu.dot_dimension_numbers<[1], [0], [0], [1], [0, 0, 1, 1], [], []>} : vector<8x512xbf16>, vector<512x512xbf16>, vector<8x512xf32> -> vector<8x512xf32>
    %c2 = arith.constant 2 : index
    %c0_16 = arith.constant 0 : index
    %22 = vector.load %arg3[%c2, %c0_16] : memref<3x512xf32, #tpu.memory_space<vmem>>, vector<1x512xf32>
    %23 = vector.broadcast %22 : vector<1x512xf32> to vector<8x512xf32>
    %24 = arith.addf %21, %23 : vector<8x512xf32>
    %cst_17 = arith.constant 0.000000e+00 : f32
    %25 = vector.broadcast %cst_17 : f32 to vector<8x512xf32>
    %26 = arith.maximumf %24, %25 : vector<8x512xf32>
    %c0_18 = arith.constant 0 : index
    %c0_19 = arith.constant 0 : index
    %27 = vector.load %arg5[%c0_18, %c0_19] : memref<8x512xf32, #tpu.memory_space<vmem>>, vector<8x512xf32>
    tpu.vector_store %arg5[%c0_18, %c0_19], %26 {strides = array<i32>} : memref<8x512xf32, #tpu.memory_space<vmem>>, vector<8x512xf32>,
    return
  }
  func.func @transform_0(%arg0: i32) -> (i32, i32) {
    %c0_i32 = arith.constant 0 : i32
    %c0_i32_0 = arith.constant 0 : i32
    return %arg0, %c0_i32 : i32, i32
  }
  func.func @transform_1(%arg0: i32) -> (i32, i32) {
    %c0_i32 = arith.constant 0 : i32
    %c0_i32_0 = arith.constant 0 : i32
    %c0_i32_1 = arith.constant 0 : i32
    return %c0_i32, %c0_i32_0 : i32, i32
  }
  func.func @transform_2(%arg0: i32) -> (i32, i32) {
    %c0_i32 = arith.constant 0 : i32
    %c0_i32_0 = arith.constant 0 : i32
    %c0_i32_1 = arith.constant 0 : i32
    return %c0_i32, %c0_i32_0 : i32, i32
  }
  func.func @transform_3(%arg0: i32) -> (i32, i32, i32) {
    %c0_i32 = arith.constant 0 : i32
    %c0_i32_0 = arith.constant 0 : i32
    %c0_i32_1 = arith.constant 0 : i32
    %c0_i32_2 = arith.constant 0 : i32
    return %c0_i32, %c0_i32_0, %c0_i32_1 : i32, i32, i32
  }
  func.func @transform_4(%arg0: i32) -> (i32, i32) {
    %c0_i32 = arith.constant 0 : i32
    %c0_i32_0 = arith.constant 0 : i32
    return %arg0, %c0_i32 : i32, i32
  }
}

</mosaic_0001>

<bundles_post_ra>
// kernel: tpu_custom_call.1
= control target key start
LH: loop header
LB: loop body
LE: loop exit
PB: predicated region body
PF: predicated region fallthrough
CT: control target
= control target key end

     0   :  { %9 = vsyncpa [#allocation3], 0  ;;  %s4027_s0 = inlined_call_operand.hbm [shape: f32[8,128], index: 0, kind: input, shape index: {}]   ;;  %s4028_s1 = inlined_call_operand.hbm [shape: bf16[128,512], index: 1, kind: input, shape index: {}]   ;;  %s4029_s2 = inlined_call_operand.hbm [shape: f32[3,512], index: 2, kind: input, shape index: {}]   ;;  %s4030_s3 = inlined_call_operand.hbm [shape: bf16[2,512,512], index: 3, kind: input, shape index: {}]   ;;  %s4031_s4 = inlined_call_operand.hbm [shape: f32[8,512], index: 4, kind: output, shape index: {}]  }
   0x1   :  { %10 = vsyncpa [#allocation6], 0 }
   0x2   :  { %11 = vsyncpa [#allocation9], 0  ;;  %s28_s17 = sshll.u32 %s4028_s1, 4  ;;  %s29_s17 = int_to_ptr.hbm [resolvable:$true] %s28_s17 }
   0x3   :  { %12 = vsyncpa [#allocation4], 0  ;;  %s3926_s18 = smov [#allocation5]   ;;  %s18_s22 = sshll.u32 %s4027_s0, 4  ;;  %s19_s22 = int_to_ptr.hbm [resolvable:$true] %s18_s22 }
   0x4   :  { %s30_s19 = sshll.u32 %s3926_s18, 4  ;;  %s3927_s23 = smov 256   ;;  %s31_s19 = int_to_ptr.vmem [resolvable:$true] %s30_s19 }
   0x5   :  { %s3928_s24 = smov 16   ;;  %s3929_s25 = smov [#allocation2]  }
   0x6   :  { %36 = dma.hbm_to_vmem [thread:$0]  %s29_s17, 4096, %s31_s19, [#allocation6], %s3927_s23, %s3927_s23, %s3928_s24  }
   0x7   :  { %s20_s26 = sshll.u32 %s3929_s25, 4  ;;  %s42_s29 = sshll.u32 %s4029_s2, 4  ;;  %s21_s26 = int_to_ptr.vmem [resolvable:$true] %s20_s26  ;;  %s43_s29 = int_to_ptr.hbm [resolvable:$true] %s42_s29 }
   0x8   :  { %23 = dma.hbm_to_vmem [thread:$0]  %s19_s22, 128, %s21_s26, [#allocation3]  }
   0x9   :  { %s52_s5 = sshll.u32 %s4030_s3, 4  ;;  %s3930_s6 = smov [#allocation7]   ;;  %s53_s5 = int_to_ptr.hbm [resolvable:$true] %s52_s5 }
   0xa   :  { %s44_s7 = sshll.u32 %s3930_s6, 4  ;;  %s3931_s0 = smov [#allocation8]   ;;  %s45_s7 = int_to_ptr.vmem [resolvable:$true] %s44_s7 }
   0xb   :  { %47 = dma.hbm_to_vmem [thread:$0]  %s43_s29, 256, %s45_s7, [#allocation6]  }
   0xc   :  { %s54_s8 = sshll.u32 %s3931_s0, 4  ;;  %s55_s8 = int_to_ptr.vmem [resolvable:$true] %s54_s8 }
   0xd   :  { %60 = dma.hbm_to_vmem [thread:$0]  %s53_s5, 32768, %s55_s8, [#allocation9], %s3927_s23, %s3927_s23, %s3928_s24  }
   0xe   :  { %3918 = dma.done.wait [#allocation3], 128  }
   0xf   :  { %3919 = vsyncadd [#allocation3], 4294967168 }
  0x10   :  { %3920 = dma.done.wait [#allocation6], 4352  }
  0x11   :  { %3921 = vsyncadd [#allocation6], 4294962944 }
  0x12   :  { %3922 = dma.done.wait [#allocation9], 32768  }
  0x13   :  { %3923 = vsyncadd [#allocation9], 4294934528  ;;  %v2465_v0 = vld [vmem:[#allocation5 + $0xe0] sm:$0xf]  ;;  %v3533_v1 = vld [vmem:[#allocation5 + $0xec] sm:$0xf0] }
  0x14   :  { %v3531_v2 = vld [vmem:[#allocation5 + $0xe4] sm:$0xf]  ;;  %v2466_v3 = vor.u32 %v3533_v1, %v2465_v0  ;;  %v2467_v4 = vld [vmem:[#allocation5 + $0xf0] sm:$0xf0]  ;;  %v2473_v5 = vld [vmem:[#allocation5 + $0xe8] sm:$0xf] }
  0x15   :  { %v3534_v6 = vld [vmem:[#allocation5 + $0xf4] sm:$0xf0]  ;;  %v2470_v7 = vor.u32 %v3531_v2, %v2467_v4  ;;  %v3532_v9 = vld [vmem:[#allocation5 + $0xec] sm:$0xf]  ;;  %v2475_v10 = vld [vmem:[#allocation5 + $0xf8] sm:$0xf0] }
  0x16   :  { %v2474_v8 = vor.u32 %v3534_v6, %v2473_v5  ;;  %v2449_v11 = vld [vmem:[#allocation5 + $0xc0] sm:$0xf]  ;;  %281 = vmatpush.bf16.msra.mxu0 %v2466_v3  ;;  %v2478_v12 = vor.u32 %v3532_v9, %v2475_v10  ;;  %v3529_v13 = vld [vmem:[#allocation5 + $0xcc] sm:$0xf0]  ;;  %v3527_v14 = vld [vmem:[#allocation5 + $0xc4] sm:$0xf] }
  0x17   :  { %v2451_v15 = vld [vmem:[#allocation5 + $0xd0] sm:$0xf0]  ;;  %294 = vmatpush.bf16.msra.mxu1 %v2470_v7  ;;  %v2450_v16 = vor.u32 %v3529_v13, %v2449_v11  ;;  %v2457_v18 = vld [vmem:[#allocation5 + $0xc8] sm:$0xf]  ;;  %v3530_v19 = vld [vmem:[#allocation5 + $0xd4] sm:$0xf0] }
  0x18   :  { %307 = vmatpush.bf16.msra.mxu2 %v2474_v8  ;;  %v2454_v17 = vor.u32 %v3527_v14, %v2451_v15  ;;  %v3528_v20 = vld [vmem:[#allocation5 + $0xcc] sm:$0xf]  ;;  %320 = vmatpush.bf16.msra.mxu3 %v2478_v12  ;;  %v2458_v21 = vor.u32 %v3530_v19, %v2457_v18  ;;  %v2459_v22 = vld [vmem:[#allocation5 + $0xd8] sm:$0xf0]  ;;  %v2433_v23 = vld [vmem:[#allocation5 + $0xa0] sm:$0xf] }
  0x19   :  { %v3525_v24 = vld [vmem:[#allocation5 + $0xac] sm:$0xf0]  ;;  %v2462_v25 = vor.u32 %v3528_v20, %v2459_v22  ;;  %v3523_v26 = vld [vmem:[#allocation5 + $0xa4] sm:$0xf]  ;;  %v2435_v27 = vld [vmem:[#allocation5 + $0xb0] sm:$0xf0] }
  0x1a   :  { %v2441_v28 = vld [vmem:[#allocation5 + $0xa8] sm:$0xf]  ;;  %282 = vmatpush.bf16.msra.mxu0 %v2450_v16  ;;  %v2434_v29 = vor.u32 %v3525_v24, %v2433_v23  ;;  %v3526_v30 = vld [vmem:[#allocation5 + $0xb4] sm:$0xf0]  ;;  %v3524_v31 = vld [vmem:[#allocation5 + $0xac] sm:$0xf]  ;;  %v2438_v33 = vor.u32 %v3523_v26, %v2435_v27 }
  0x1b   :  { %v2443_v32 = vld [vmem:[#allocation5 + $0xb8] sm:$0xf0]  ;;  %295 = vmatpush.bf16.msra.mxu1 %v2454_v17  ;;  %v2442_v34 = vor.u32 %v3526_v30, %v2441_v28  ;;  %v2417_v35 = vld [vmem:[#allocation5 + $0x80] sm:$0xf]  ;;  %v3521_v36 = vld [vmem:[#allocation5 + $0x8c] sm:$0xf0] }
  0x1c   :  { %308 = vmatpush.bf16.msra.mxu2 %v2458_v21  ;;  %v3519_v37 = vld [vmem:[#allocation5 + $0x84] sm:$0xf]  ;;  %321 = vmatpush.bf16.msra.mxu3 %v2462_v25  ;;  %v2446_v38 = vor.u32 %v3524_v31, %v2443_v32  ;;  %v2419_v39 = vld [vmem:[#allocation5 + $0x90] sm:$0xf0]  ;;  %v2425_v40 = vld [vmem:[#allocation5 + $0x88] sm:$0xf]  ;;  %v2418_v44 = vor.u32 %v3521_v36, %v2417_v35 }
  0x1d   :  { %v3522_v41 = vld [vmem:[#allocation5 + $0x94] sm:$0xf0]  ;;  %v3520_v42 = vld [vmem:[#allocation5 + $0x8c] sm:$0xf]  ;;  %v2427_v43 = vld [vmem:[#allocation5 + $0x98] sm:$0xf0]  ;;  %v2422_v45 = vor.u32 %v3519_v37, %v2419_v39 }
  0x1e   :  { %283 = vmatpush.bf16.msra.mxu0 %v2434_v29  ;;  %v2426_v46 = vor.u32 %v3522_v41, %v2425_v40  ;;  %v2401_v47 = vld [vmem:[#allocation5 + $0x60] sm:$0xf]  ;;  %v3517_v48 = vld [vmem:[#allocation5 + $0x6c] sm:$0xf0]  ;;  %v3515_v49 = vld [vmem:[#allocation5 + $0x64] sm:$0xf]  ;;  %v2430_v50 = vor.u32 %v3520_v42, %v2427_v43 }
  0x1f   :  { %296 = vmatpush.bf16.msra.mxu1 %v2438_v33  ;;  %v2403_v51 = vld [vmem:[#allocation5 + $0x70] sm:$0xf0]  ;;  %v2409_v52 = vld [vmem:[#allocation5 + $0x68] sm:$0xf]  ;;  %v3518_v53 = vld [vmem:[#allocation5 + $0x74] sm:$0xf0]  ;;  %v2402_v56 = vor.u32 %v3517_v48, %v2401_v47 }
  0x20   :  { %309 = vmatpush.bf16.msra.mxu2 %v2442_v34  ;;  %322 = vmatpush.bf16.msra.mxu3 %v2446_v38  ;;  %v3516_v54 = vld [vmem:[#allocation5 + $0x6c] sm:$0xf]  ;;  %v2411_v55 = vld [vmem:[#allocation5 + $0x78] sm:$0xf0]  ;;  %v2406_v57 = vor.u32 %v3515_v49, %v2403_v51  ;;  %v2410_v58 = vor.u32 %v3518_v53, %v2409_v52  ;;  %v2385_v59 = vld [vmem:[#allocation5 + $0x40] sm:$0xf] }
  0x21   :  { %v3513_v60 = vld [vmem:[#allocation5 + $0x4c] sm:$0xf0]  ;;  %v3511_v61 = vld [vmem:[#allocation5 + $0x44] sm:$0xf]  ;;  %v2414_v62 = vor.u32 %v3516_v54, %v2411_v55  ;;  %v2387_v63 = vld [vmem:[#allocation5 + $0x50] sm:$0xf0] }
  0x22   :  { %284 = vmatpush.bf16.msra.mxu0 %v2418_v44  ;;  %v2393_v0 = vld [vmem:[#allocation5 + $0x48] sm:$0xf]  ;;  %v3514_v1 = vld [vmem:[#allocation5 + $0x54] sm:$0xf0]  ;;  %v3512_v2 = vld [vmem:[#allocation5 + $0x4c] sm:$0xf]  ;;  %v2386_v4 = vor.u32 %v3513_v60, %v2385_v59  ;;  %v2390_v5 = vor.u32 %v3511_v61, %v2387_v63 }
  0x23   :  { %297 = vmatpush.bf16.msra.mxu1 %v2422_v45  ;;  %v2395_v3 = vld [vmem:[#allocation5 + $0x58] sm:$0xf0]  ;;  %v2394_v6 = vor.u32 %v3514_v1, %v2393_v0  ;;  %v2369_v7 = vld [vmem:[#allocation5 + $0x20] sm:$0xf]  ;;  %v3509_v8 = vld [vmem:[#allocation5 + $0x2c] sm:$0xf0] }
  0x24   :  { %310 = vmatpush.bf16.msra.mxu2 %v2426_v46  ;;  %323 = vmatpush.bf16.msra.mxu3 %v2430_v50  ;;  %v3507_v9 = vld [vmem:[#allocation5 + $0x24] sm:$0xf]  ;;  %v2398_v10 = vor.u32 %v3512_v2, %v2395_v3  ;;  %v2371_v11 = vld [vmem:[#allocation5 + $0x30] sm:$0xf0]  ;;  %v2377_v12 = vld [vmem:[#allocation5 + $0x28] sm:$0xf]  ;;  %v2370_v16 = vor.u32 %v3509_v8, %v2369_v7 }
  0x25   :  { %v3510_v13 = vld [vmem:[#allocation5 + $0x34] sm:$0xf0]  ;;  %v3508_v14 = vld [vmem:[#allocation5 + $0x2c] sm:$0xf]  ;;  %v2379_v15 = vld [vmem:[#allocation5 + $0x38] sm:$0xf0]  ;;  %v2374_v18 = vor.u32 %v3507_v9, %v2371_v11 }
  0x26   :  { %285 = vmatpush.bf16.msra.mxu0 %v2402_v56  ;;  %v2353_v17 = vld [vmem:[#allocation5] sm:$0xf]  ;;  %v2378_v19 = vor.u32 %v3510_v13, %v2377_v12  ;;  %v3505_v20 = vld [vmem:[#allocation5 + $0xc] sm:$0xf0]  ;;  %v3503_v21 = vld [vmem:[#allocation5 + $0x4] sm:$0xf]  ;;  %v2382_v23 = vor.u32 %v3508_v14, %v2379_v15 }
  0x27   :  { %298 = vmatpush.bf16.msra.mxu1 %v2406_v57  ;;  %v2355_v22 = vld [vmem:[#allocation5 + $0x10] sm:$0xf0]  ;;  %v2361_v24 = vld [vmem:[#allocation5 + $0x8] sm:$0xf]  ;;  %v3506_v25 = vld [vmem:[#allocation5 + $0x14] sm:$0xf0]  ;;  %v2354_v30 = vor.u32 %v3505_v20, %v2353_v17 }
  0x28   :  { %311 = vmatpush.bf16.msra.mxu2 %v2410_v58  ;;  %324 = vmatpush.bf16.msra.mxu3 %v2414_v62  ;;  %v3504_v26 = vld [vmem:[#allocation5 + $0xc] sm:$0xf]  ;;  %v2363_v27 = vld [vmem:[#allocation5 + $0x18] sm:$0xf0]  ;;  %v2593_v28 = vld [vmem:[#allocation8 + $0xe0] sm:$0xf]  ;;  %v2358_v34 = vor.u32 %v3503_v21, %v2355_v22  ;;  %v2362_v35 = vor.u32 %v3506_v25, %v2361_v24 }
  0x29   :  { %v3565_v29 = vld [vmem:[#allocation8 + $0xec] sm:$0xf0]  ;;  %v77_v31 = vld [vmem:[#allocation2] sm:$0xff]  ;;  %v2721_v32 = vld [vmem:[#allocation8 + $0x1e0] sm:$0xf]  ;;  %v2366_v36 = vor.u32 %v3504_v26, %v2363_v27  ;;  %s3932_s2 = smov [#allocation10]  }
  0x2a   :  { %286 = vmatpush.bf16.msra.mxu0 %v2386_v4  ;;  %v3597_v33 = vld [vmem:[#allocation8 + $0x1ec] sm:$0xf0]  ;;  %v2594_v37 = vor.u32 %v3565_v29, %v2593_v28  ;;  %v2577_v38 = vld [vmem:[#allocation8 + $0xc0] sm:$0xf]  ;;  %v78_v41 = vpack.c.bf16 %v77_v31, %v77_v31  ;;  %s2337_s3 = sshll.u32 %s3932_s2, 4  ;;  %s2339_s11 = sshll.u32 %s4031_s4, 4  ;;  %s2338_s3 = int_to_ptr.vmem [resolvable:$true] %s2337_s3  ;;  %s2340_s11 = int_to_ptr.hbm [resolvable:$true] %s2339_s11 }
  0x2b   :  { %299 = vmatpush.bf16.msra.mxu1 %v2390_v5  ;;  %v2849_v39 = vld [vmem:[#allocation8 + $0x2e0] sm:$0xf]  ;;  %v3629_v40 = vld [vmem:[#allocation8 + $0x2ec] sm:$0xf0]  ;;  %v2722_v42 = vor.u32 %v3597_v33, %v2721_v32 }
  0x2c   :  { %312 = vmatpush.bf16.msra.mxu2 %v2394_v6  ;;  %325 = vmatpush.bf16.msra.mxu3 %v2398_v10  ;;  %v3561_v43 = vld [vmem:[#allocation8 + $0xcc] sm:$0xf0]  ;;  %v2977_v44 = vld [vmem:[#allocation8 + $0x3e0] sm:$0xf]  ;;  %v2850_v48 = vor.u32 %v3629_v40, %v2849_v39 }
  0x2d   :  { %v3661_v45 = vld [vmem:[#allocation8 + $0x3ec] sm:$0xf0]  ;;  %v2705_v46 = vld [vmem:[#allocation8 + $0x1c0] sm:$0xf]  ;;  %v2578_v49 = vor.u32 %v3561_v43, %v2577_v38 }
  0x2e   :  { %287 = vmatpush.bf16.msra.mxu0 %v2370_v16  ;;  %v3593_v47 = vld [vmem:[#allocation8 + $0x1cc] sm:$0xf0]  ;;  %v2978_v50 = vor.u32 %v3661_v45, %v2977_v44  ;;  %v2561_v51 = vld [vmem:[#allocation8 + $0xa0] sm:$0xf] }
  0x2f   :  { %300 = vmatpush.bf16.msra.mxu1 %v2374_v18  ;;  %v2833_v52 = vld [vmem:[#allocation8 + $0x2c0] sm:$0xf]  ;;  %v3625_v53 = vld [vmem:[#allocation8 + $0x2cc] sm:$0xf0]  ;;  %v2706_v54 = vor.u32 %v3593_v47, %v2705_v46 }
  0x30   :  { %313 = vmatpush.bf16.msra.mxu2 %v2378_v19  ;;  %326 = vmatpush.bf16.msra.mxu3 %v2382_v23  ;;  %v3557_v55 = vld [vmem:[#allocation8 + $0xac] sm:$0xf0]  ;;  %v2961_v56 = vld [vmem:[#allocation8 + $0x3c0] sm:$0xf]  ;;  %v2834_v60 = vor.u32 %v3625_v53, %v2833_v52 }
  0x31   :  { %v3657_v57 = vld [vmem:[#allocation8 + $0x3cc] sm:$0xf0]  ;;  %v2689_v58 = vld [vmem:[#allocation8 + $0x1a0] sm:$0xf]  ;;  %v2562_v61 = vor.u32 %v3557_v55, %v2561_v51 }
  0x32   :  { %288 = vmatpush.bf16.msra.mxu0 %v2354_v30  ;;  %v3589_v59 = vld [vmem:[#allocation8 + $0x1ac] sm:$0xf0]  ;;  %v2962_v62 = vor.u32 %v3657_v57, %v2961_v56  ;;  %v2545_v63 = vld [vmem:[#allocation8 + $0x80] sm:$0xf]  ;;  %v3563_v56 = vld [vmem:[#allocation8 + $0xe4] sm:$0xf] }
  0x33   :  { %301 = vmatpush.bf16.msra.mxu1 %v2358_v34  ;;  %v2817_v0 = vld [vmem:[#allocation8 + $0x2a0] sm:$0xf]  ;;  %v3621_v1 = vld [vmem:[#allocation8 + $0x2ac] sm:$0xf0]  ;;  %v2690_v2 = vor.u32 %v3589_v59, %v2689_v58  ;;  %v2595_v57 = vld [vmem:[#allocation8 + $0xf0] sm:$0xf0] }
  0x34   :  { %314 = vmatpush.bf16.msra.mxu2 %v2362_v35  ;;  %327 = vmatpush.bf16.msra.mxu3 %v2366_v36  ;;  %v3553_v3 = vld [vmem:[#allocation8 + $0x8c] sm:$0xf0]  ;;  %v2945_v4 = vld [vmem:[#allocation8 + $0x3a0] sm:$0xf]  ;;  %v2818_v8 = vor.u32 %v3621_v1, %v2817_v0  ;;  %v3595_v58 = vld [vmem:[#allocation8 + $0x1e4] sm:$0xf] }
  0x35   :  { %289 = vmatmul.bf16.vlgmr.msra.gmra.mxu0 %v78_v41  ;;  %v3653_v5 = vld [vmem:[#allocation8 + $0x3ac] sm:$0xf0]  ;;  %v2673_v6 = vld [vmem:[#allocation8 + $0x180] sm:$0xf]  ;;  %v2546_v9 = vor.u32 %v3553_v3, %v2545_v63  ;;  %v2723_v59 = vld [vmem:[#allocation8 + $0x1f0] sm:$0xf0] }
  0x36   :  { %1120 = vmatpush.bf16.msrb.mxu0 %v2594_v37  ;;  %302 = vmatmul.bf16.vlgmr.msra.gmra.mxu1 %v78_v41  ;;  %v3585_v7 = vld [vmem:[#allocation8 + $0x18c] sm:$0xf0]  ;;  %v2946_v10 = vor.u32 %v3653_v5, %v2945_v4  ;;  %v2529_v11 = vld [vmem:[#allocation8 + $0x60] sm:$0xf]  ;;  %v3559_v63 = vld [vmem:[#allocation8 + $0xc4] sm:$0xf]  ;;  %v2598_v4 = vor.u32 %v3563_v56, %v2595_v57 }
  0x37   :  { %1133 = vmatpush.bf16.msrb.mxu1 %v2722_v42  ;;  %315 = vmatmul.bf16.vlgmr.msra.gmra.mxu2 %v78_v41  ;;  %v2801_v12 = vld [vmem:[#allocation8 + $0x280] sm:$0xf]  ;;  %v3617_v13 = vld [vmem:[#allocation8 + $0x28c] sm:$0xf0]  ;;  %v2674_v14 = vor.u32 %v3585_v7, %v2673_v6  ;;  %v3627_v6 = vld [vmem:[#allocation8 + $0x2e4] sm:$0xf] }
  0x38   :  { %328 = vmatmul.bf16.vlgmr.msra.gmra.mxu3 %v78_v41  ;;  %1146 = vmatpush.bf16.msrb.mxu2 %v2850_v48  ;;  %v3549_v15 = vld [vmem:[#allocation8 + $0x6c] sm:$0xf0]  ;;  %v2929_v16 = vld [vmem:[#allocation8 + $0x380] sm:$0xf]  ;;  %v2802_v20 = vor.u32 %v3617_v13, %v2801_v12  ;;  %v2851_v7 = vld [vmem:[#allocation8 + $0x2f0] sm:$0xf0] }
  0x39   :  { %1159 = vmatpush.bf16.msrb.mxu3 %v2978_v50  ;;  %v3649_v17 = vld [vmem:[#allocation8 + $0x38c] sm:$0xf0]  ;;  %v2657_v18 = vld [vmem:[#allocation8 + $0x160] sm:$0xf]  ;;  %v2530_v21 = vor.u32 %v3549_v15, %v2529_v11  ;;  %v2979_v11 = vld [vmem:[#allocation8 + $0x3f0] sm:$0xf0] }
  0x3a   :  { %1121 = vmatpush.bf16.msrb.mxu0 %v2578_v49  ;;  %v3581_v19 = vld [vmem:[#allocation8 + $0x16c] sm:$0xf0]  ;;  %v2930_v22 = vor.u32 %v3649_v17, %v2929_v16  ;;  %v2513_v23 = vld [vmem:[#allocation8 + $0x40] sm:$0xf]  ;;  %v3591_v12 = vld [vmem:[#allocation8 + $0x1c4] sm:$0xf]  ;;  %v2854_v16 = vor.u32 %v3627_v6, %v2851_v7 }
  0x3b   :  { %1134 = vmatpush.bf16.msrb.mxu1 %v2706_v54  ;;  %v2785_v24 = vld [vmem:[#allocation8 + $0x260] sm:$0xf]  ;;  %v3613_v25 = vld [vmem:[#allocation8 + $0x26c] sm:$0xf0]  ;;  %v2658_v26 = vor.u32 %v3581_v19, %v2657_v18  ;;  %v2707_v13 = vld [vmem:[#allocation8 + $0x1d0] sm:$0xf0] }
  0x3c   :  { %1147 = vmatpush.bf16.msrb.mxu2 %v2834_v60  ;;  %v3545_v27 = vld [vmem:[#allocation8 + $0x4c] sm:$0xf0]  ;;  %v2913_v28 = vld [vmem:[#allocation8 + $0x360] sm:$0xf]  ;;  %v2786_v32 = vor.u32 %v3613_v25, %v2785_v24  ;;  %v3555_v19 = vld [vmem:[#allocation8 + $0xa4] sm:$0xf] }
  0x3d   :  { %1160 = vmatpush.bf16.msrb.mxu3 %v2962_v62  ;;  %v3645_v29 = vld [vmem:[#allocation8 + $0x36c] sm:$0xf0]  ;;  %v2641_v30 = vld [vmem:[#allocation8 + $0x140] sm:$0xf]  ;;  %v2514_v33 = vor.u32 %v3545_v27, %v2513_v23  ;;  %v2563_v23 = vld [vmem:[#allocation8 + $0xb0] sm:$0xf0] }
  0x3e   :  { %1122 = vmatpush.bf16.msrb.mxu0 %v2562_v61  ;;  %v3577_v31 = vld [vmem:[#allocation8 + $0x14c] sm:$0xf0]  ;;  %v2914_v34 = vor.u32 %v3645_v29, %v2913_v28  ;;  %v2497_v35 = vld [vmem:[#allocation8 + $0x20] sm:$0xf]  ;;  %v3655_v24 = vld [vmem:[#allocation8 + $0x3c4] sm:$0xf]  ;;  %v2566_v29 = vor.u32 %v3555_v19, %v2563_v23 }
  0x3f   :  { %1135 = vmatpush.bf16.msrb.mxu1 %v2690_v2  ;;  %v2769_v36 = vld [vmem:[#allocation8 + $0x240] sm:$0xf]  ;;  %v3609_v37 = vld [vmem:[#allocation8 + $0x24c] sm:$0xf0]  ;;  %v2642_v38 = vor.u32 %v3577_v31, %v2641_v30  ;;  %v2963_v25 = vld [vmem:[#allocation8 + $0x3d0] sm:$0xf0] }
  0x40   :  { %1148 = vmatpush.bf16.msrb.mxu2 %v2818_v8  ;;  %v3541_v39 = vld [vmem:[#allocation8 + $0x2c] sm:$0xf0]  ;;  %v2897_v40 = vld [vmem:[#allocation8 + $0x340] sm:$0xf]  ;;  %v2770_v44 = vor.u32 %v3609_v37, %v2769_v36  ;;  %v2726_v8 = vor.u32 %v3595_v58, %v2723_v59  ;;  %v2691_v27 = vld [vmem:[#allocation8 + $0x1b0] sm:$0xf0]  ;;  %v2966_v30 = vor.u32 %v3655_v24, %v2963_v25 }
  0x41   :  { %1161 = vmatpush.bf16.msrb.mxu3 %v2946_v10  ;;  %v3641_v41 = vld [vmem:[#allocation8 + $0x34c] sm:$0xf0]  ;;  %v2625_v42 = vld [vmem:[#allocation8 + $0x120] sm:$0xf]  ;;  %v2498_v46 = vor.u32 %v3541_v39, %v2497_v35  ;;  %v3659_v10 = vld [vmem:[#allocation8 + $0x3e4] sm:$0xf] }
  0x42   :  { %1123 = vmatpush.bf16.msrb.mxu0 %v2546_v9  ;;  %v3573_v43 = vld [vmem:[#allocation8 + $0x12c] sm:$0xf0]  ;;  %v2481_v45 = vld [vmem:[#allocation8] sm:$0xf]  ;;  %v2898_v47 = vor.u32 %v3641_v41, %v2897_v40  ;;  %v2579_v9 = vld [vmem:[#allocation8 + $0xd0] sm:$0xf0]  ;;  %v2982_v18 = vor.u32 %v3659_v10, %v2979_v11 }
  0x43   :  { %1136 = vmatpush.bf16.msrb.mxu1 %v2674_v14  ;;  %v3537_v48 = vld [vmem:[#allocation8 + $0xc] sm:$0xf0]  ;;  %v2753_v49 = vld [vmem:[#allocation8 + $0x220] sm:$0xf]  ;;  %v2626_v51 = vor.u32 %v3573_v43, %v2625_v42  ;;  %v2582_v17 = vor.u32 %v3559_v63, %v2579_v9  ;;  %v3551_v31 = vld [vmem:[#allocation8 + $0x84] sm:$0xf] }
  0x44   :  { %1149 = vmatpush.bf16.msrb.mxu2 %v2802_v20  ;;  %v3605_v50 = vld [vmem:[#allocation8 + $0x22c] sm:$0xf0]  ;;  %v2609_v52 = vld [vmem:[#allocation8 + $0x100] sm:$0xf]  ;;  %v2482_v61 = vor.u32 %v3537_v48, %v2481_v45  ;;  %v3623_v20 = vld [vmem:[#allocation8 + $0x2c4] sm:$0xf] }
  0x45   :  { %1162 = vmatpush.bf16.msrb.mxu3 %v2930_v22  ;;  %v2881_v53 = vld [vmem:[#allocation8 + $0x320] sm:$0xf]  ;;  %v3637_v54 = vld [vmem:[#allocation8 + $0x32c] sm:$0xf0]  ;;  %v2754_v60 = vor.u32 %v3605_v50, %v2753_v49  ;;  %v2710_v22 = vor.u32 %v3591_v12, %v2707_v13  ;;  %v2547_v35 = vld [vmem:[#allocation8 + $0x90] sm:$0xf0] }
  0x46   :  { %1124 = vmatpush.bf16.msrb.mxu0 %v2530_v21  ;;  %v3569_v55 = vld [vmem:[#allocation8 + $0x10c] sm:$0xf0]  ;;  %v2882_v62 = vor.u32 %v3637_v54, %v2881_v53  ;;  %v2737_v0 = vld [vmem:[#allocation8 + $0x200] sm:$0xf]  ;;  %v2835_v21 = vld [vmem:[#allocation8 + $0x2d0] sm:$0xf0]  ;;  %v2550_v41 = vor.u32 %v3551_v31, %v2547_v35 }
  0x47   :  { %1137 = vmatpush.bf16.msrb.mxu1 %v2658_v26  ;;  %v3601_v1 = vld [vmem:[#allocation8 + $0x20c] sm:$0xf0]  ;;  %v2865_v2 = vld [vmem:[#allocation8 + $0x300] sm:$0xf]  ;;  %v2610_v3 = vor.u32 %v3569_v55, %v2609_v52  ;;  %v3587_v26 = vld [vmem:[#allocation8 + $0x1a4] sm:$0xf]  ;;  %v2838_v28 = vor.u32 %v3623_v20, %v2835_v21 }
  0x48   :  { %1150 = vmatpush.bf16.msrb.mxu2 %v2786_v32  ;;  %v3633_v5 = vld [vmem:[#allocation8 + $0x30c] sm:$0xf0]  ;;  %v2738_v14 = vor.u32 %v3601_v1, %v2737_v0  ;;  %v3619_v32 = vld [vmem:[#allocation8 + $0x2a4] sm:$0xf]  ;;  %v2947_v37 = vld [vmem:[#allocation8 + $0x3b0] sm:$0xf0] }
  0x49   :  { %1163 = vmatpush.bf16.msrb.mxu3 %v2914_v34  ;;  %v2866_v15 = vor.u32 %v3633_v5, %v2865_v2  ;;  %v2694_v34 = vor.u32 %v3587_v26, %v2691_v27  ;;  %v3651_v36 = vld [vmem:[#allocation8 + $0x3a4] sm:$0xf]  ;;  %v2675_v39 = vld [vmem:[#allocation8 + $0x190] sm:$0xf0] }
  0x4a   :  { %1125 = vmatpush.bf16.msrb.mxu0 %v2514_v33  ;;  %v2819_v33 = vld [vmem:[#allocation8 + $0x2b0] sm:$0xf0]  ;;  %v2950_v42 = vor.u32 %v3651_v36, %v2947_v37  ;;  %v3547_v43 = vld [vmem:[#allocation8 + $0x64] sm:$0xf] }
  0x4b   :  { %1138 = vmatpush.bf16.msrb.mxu1 %v2642_v38  ;;  %v3583_v38 = vld [vmem:[#allocation8 + $0x184] sm:$0xf]  ;;  %v2822_v40 = vor.u32 %v3619_v32, %v2819_v33  ;;  %v2803_v45 = vld [vmem:[#allocation8 + $0x290] sm:$0xf0] }
  0x4c   :  { %1151 = vmatpush.bf16.msrb.mxu2 %v2770_v44  ;;  %v3615_v44 = vld [vmem:[#allocation8 + $0x284] sm:$0xf]  ;;  %v2931_v49 = vld [vmem:[#allocation8 + $0x390] sm:$0xf0] }
  0x4d   :  { %1164 = vmatpush.bf16.msrb.mxu3 %v2898_v47  ;;  %v2531_v47 = vld [vmem:[#allocation8 + $0x70] sm:$0xf0]  ;;  %v3647_v48 = vld [vmem:[#allocation8 + $0x384] sm:$0xf]  ;;  %v2806_v52 = vor.u32 %v3615_v44, %v2803_v45  ;;  %v3598_v44 = vld [vmem:[#allocation8 + $0x1f4] sm:$0xf0] }
  0x4e   :  { %1126 = vmatpush.bf16.msrb.mxu0 %v2498_v46  ;;  %v2678_v46 = vor.u32 %v3583_v38, %v2675_v39  ;;  %v3579_v50 = vld [vmem:[#allocation8 + $0x164] sm:$0xf]  ;;  %v2534_v53 = vor.u32 %v3547_v43, %v2531_v47  ;;  %v2934_v54 = vor.u32 %v3647_v48, %v2931_v49  ;;  %v2515_v57 = vld [vmem:[#allocation8 + $0x50] sm:$0xf0]  ;;  %v2729_v43 = vld [vmem:[#allocation8 + $0x1e8] sm:$0xf] }
  0x4f   :  { %1139 = vmatpush.bf16.msrb.mxu1 %v2626_v51  ;;  %v2659_v51 = vld [vmem:[#allocation8 + $0x170] sm:$0xf0]  ;;  %v3543_v56 = vld [vmem:[#allocation8 + $0x44] sm:$0xf] }
  0x50   :  { %1152 = vmatpush.bf16.msrb.mxu2 %v2754_v60  ;;  %v2662_v55 = vor.u32 %v3579_v50, %v2659_v51  ;;  %v3575_v58 = vld [vmem:[#allocation8 + $0x144] sm:$0xf]  ;;  %v2643_v59 = vld [vmem:[#allocation8 + $0x150] sm:$0xf0]  ;;  %v2518_v60 = vor.u32 %v3543_v56, %v2515_v57  ;;  %v2730_v51 = vor.u32 %v3598_v44, %v2729_v43  ;;  %v3594_v56 = vld [vmem:[#allocation8 + $0x1d4] sm:$0xf0] }
  0x51   :  { %1165 = vmatpush.bf16.msrb.mxu3 %v2882_v62  ;;  %v3611_v62 = vld [vmem:[#allocation8 + $0x264] sm:$0xf]  ;;  %v2787_v63 = vld [vmem:[#allocation8 + $0x270] sm:$0xf0] }
  0x52   :  { %1127 = vmatpush.bf16.msrb.mxu0 %v2482_v61  ;;  %v2646_v61 = vor.u32 %v3575_v58, %v2643_v59  ;;  %v3643_v0 = vld [vmem:[#allocation8 + $0x364] sm:$0xf]  ;;  %v2790_v1 = vor.u32 %v3611_v62, %v2787_v63  ;;  %v2915_v2 = vld [vmem:[#allocation8 + $0x370] sm:$0xf0]  ;;  %v2857_v62 = vld [vmem:[#allocation8 + $0x2e8] sm:$0xf] }
  0x53   :  { %1140 = vmatpush.bf16.msrb.mxu1 %v2610_v3  ;;  %v2918_v3 = vor.u32 %v3643_v0, %v2915_v2  ;;  %v2499_v5 = vld [vmem:[#allocation8 + $0x30] sm:$0xf0]  ;;  %v3571_v7 = vld [vmem:[#allocation8 + $0x124] sm:$0xf]  ;;  %v3630_v63 = vld [vmem:[#allocation8 + $0x2f4] sm:$0xf0] }
  0x54   :  { %1153 = vmatpush.bf16.msrb.mxu2 %v2738_v14  ;;  %v3607_v10 = vld [vmem:[#allocation8 + $0x244] sm:$0xf]  ;;  %v2771_v11 = vld [vmem:[#allocation8 + $0x250] sm:$0xf0]  ;;  %v2985_v0 = vld [vmem:[#allocation8 + $0x3e8] sm:$0xf] }
  0x55   :  { %1166 = vmatpush.bf16.msrb.mxu3 %v2866_v15  ;;  %v3639_v12 = vld [vmem:[#allocation8 + $0x344] sm:$0xf]  ;;  %v2774_v13 = vor.u32 %v3607_v10, %v2771_v11  ;;  %v2899_v14 = vld [vmem:[#allocation8 + $0x350] sm:$0xf0]  ;;  %v2858_v11 = vor.u32 %v3630_v63, %v2857_v62  ;;  %v3542_v62 = vld [vmem:[#allocation8 + $0x34] sm:$0xf0] }
  0x56   :  { %1172 = vmatpush.bf16.msra.mxu0 %v2598_v4  ;;  %v3539_v4 = vld [vmem:[#allocation8 + $0x24] sm:$0xf]  ;;  %v2902_v15 = vor.u32 %v3639_v12, %v2899_v14  ;;  %v2611_v20 = vld [vmem:[#allocation8 + $0x110] sm:$0xf0]  ;;  %v2633_v63 = vld [vmem:[#allocation8 + $0x128] sm:$0xf] }
  0x57   :  { %1185 = vmatpush.bf16.msra.mxu1 %v2726_v8  ;;  %v2502_v6 = vor.u32 %v3539_v4, %v2499_v5  ;;  %v2627_v8 = vld [vmem:[#allocation8 + $0x130] sm:$0xf0]  ;;  %v3635_v25 = vld [vmem:[#allocation8 + $0x324] sm:$0xf]  ;;  %v3662_v4 = vld [vmem:[#allocation8 + $0x3f4] sm:$0xf0] }
  0x58   :  { %1198 = vmatpush.bf16.msra.mxu2 %v2854_v16  ;;  %v2630_v9 = vor.u32 %v3571_v7, %v2627_v8  ;;  %v3535_v16 = vld [vmem:[#allocation8 + $0x4] sm:$0xf]  ;;  %v2755_v23 = vld [vmem:[#allocation8 + $0x230] sm:$0xf0]  ;;  %v2569_v5 = vld [vmem:[#allocation8 + $0xa8] sm:$0xf] }
  0x59   :  { %1211 = vmatpush.bf16.msra.mxu3 %v2982_v18  ;;  %v3567_v18 = vld [vmem:[#allocation8 + $0x104] sm:$0xf]  ;;  %v2883_v26 = vld [vmem:[#allocation8 + $0x330] sm:$0xf0]  ;;  %v2697_v8 = vld [vmem:[#allocation8 + $0x1a8] sm:$0xf] }
  0x5a   :  { %1173 = vmatpush.bf16.msra.mxu0 %v2582_v17  ;;  %v2483_v17 = vld [vmem:[#allocation8 + $0x10] sm:$0xf0]  ;;  %v2614_v21 = vor.u32 %v3567_v18, %v2611_v20  ;;  %v2886_v27 = vor.u32 %v3635_v25, %v2883_v26  ;;  %v3631_v31 = vld [vmem:[#allocation8 + $0x304] sm:$0xf]  ;;  %v3658_v20 = vld [vmem:[#allocation8 + $0x3d4] sm:$0xf0] }
  0x5b   :  { %1186 = vmatpush.bf16.msra.mxu1 %v2710_v22  ;;  %v2486_v19 = vor.u32 %v3535_v16, %v2483_v17  ;;  %v3603_v22 = vld [vmem:[#allocation8 + $0x224] sm:$0xf]  ;;  %v2867_v32 = vld [vmem:[#allocation8 + $0x310] sm:$0xf0]  ;;  %v3626_v16 = vld [vmem:[#allocation8 + $0x2d4] sm:$0xf0] }
  0x5c   :  { %1199 = vmatpush.bf16.msra.mxu2 %v2838_v28  ;;  %v2758_v24 = vor.u32 %v3603_v22, %v2755_v23  ;;  %v3599_v28 = vld [vmem:[#allocation8 + $0x204] sm:$0xf]  ;;  %v2870_v33 = vor.u32 %v3631_v31, %v2867_v32  ;;  %v2969_v17 = vld [vmem:[#allocation8 + $0x3c8] sm:$0xf]  ;;  %v3554_v22 = vld [vmem:[#allocation8 + $0x94] sm:$0xf0] }
  0x5d   :  { %1212 = vmatpush.bf16.msra.mxu3 %v2966_v30  ;;  %v2681_v23 = vld [vmem:[#allocation8 + $0x188] sm:$0xf]  ;;  %v3622_v31 = vld [vmem:[#allocation8 + $0x2b4] sm:$0xf0] }
  0x5e   :  { %1174 = vmatpush.bf16.msra.mxu0 %v2566_v29  ;;  %v2739_v29 = vld [vmem:[#allocation8 + $0x210] sm:$0xf0] }
  0x5f   :  { %1187 = vmatpush.bf16.msra.mxu1 %v2694_v34  ;;  %v2742_v30 = vor.u32 %v3599_v28, %v2739_v29  ;;  %v111_v34 = vld [vmem:[#allocation7] ss:$4 sm:$0xf]  ;;  %v2970_v28 = vor.u32 %v3658_v20, %v2969_v17  ;;  %v3596_v17 = vld [vmem:[#allocation8 + $0x1ec] sm:$0xf] }
  0x60   :  { %1200 = vmatpush.bf16.msra.mxu2 %v2822_v40  ;;  %v113_v35 = vperm.slane %v111_v34, 0  ;;  %v114_v36 = vperm.slane %v111_v34, 1  ;;  %v2601_v40 = vld [vmem:[#allocation8 + $0xe8] sm:$0xf]  ;;  %v115_v47 = vperm.slane %v111_v34, 2  ;;  %v116_v50 = vperm.slane %v111_v34, 3 }
  0x61   :  { %1213 = vmatpush.bf16.msra.mxu3 %v2950_v42  ;;  %v3654_v34 = vld [vmem:[#allocation8 + $0x3b4] sm:$0xf0] }
  0x62   :  { %1175 = vmatpush.bf16.msra.mxu0 %v2550_v41  ;;  %v3566_v41 = vld [vmem:[#allocation8 + $0xf4] sm:$0xf0] }
  0x63   :  { %1188 = vmatpush.bf16.msra.mxu1 %v2678_v46  ;;  %v2602_v48 = vor.u32 %v3566_v41, %v2601_v40  ;;  %v2809_v41 = vld [vmem:[#allocation8 + $0x288] sm:$0xf] }
  0x64   :  { %1201 = vmatpush.bf16.msra.mxu2 %v2806_v52  ;;  %v2585_v52 = vld [vmem:[#allocation8 + $0xc8] sm:$0xf] }
  0x65   :  { %1214 = vmatpush.bf16.msra.mxu3 %v2934_v54 }
  0x66   :  { %1176 = vmatpush.bf16.msra.mxu0 %v2534_v53  ;;  %v3562_v53 = vld [vmem:[#allocation8 + $0xd4] sm:$0xf0] }
  0x67   :  { %1189 = vmatpush.bf16.msra.mxu1 %v2662_v55  ;;  %v2713_v55 = vld [vmem:[#allocation8 + $0x1c8] sm:$0xf] }
  0x68   :  { %1202 = vmatpush.bf16.msra.mxu2 %v2790_v1 }
  0x69   :  { %1215 = vmatpush.bf16.msra.mxu3 %v2918_v3  ;;  %v2714_v3 = vor.u32 %v3594_v56, %v2713_v55  ;;  %v2793_v55 = vld [vmem:[#allocation8 + $0x268] sm:$0xf]  ;;  %v3614_v56 = vld [vmem:[#allocation8 + $0x274] sm:$0xf0] }
  0x6a   :  { %1177 = vmatpush.bf16.msra.mxu0 %v2518_v60 }
  0x6b   :  { %1190 = vmatpush.bf16.msra.mxu1 %v2646_v61  ;;  %v2586_v61 = vor.u32 %v3562_v53, %v2585_v52 }
  0x6c   :  { %1203 = vmatpush.bf16.msra.mxu2 %v2774_v13  ;;  %v2986_v13 = vor.u32 %v3662_v4, %v2985_v0  ;;  %v3574_v0 = vld [vmem:[#allocation8 + $0x134] sm:$0xf0] }
  0x6d   :  { %1216 = vmatpush.bf16.msra.mxu3 %v2902_v15  ;;  %v2841_v15 = vld [vmem:[#allocation8 + $0x2c8] sm:$0xf]  ;;  %v3610_v4 = vld [vmem:[#allocation8 + $0x254] sm:$0xf0] }
  0x6e   :  { %1178 = vmatpush.bf16.msra.mxu0 %v2502_v6  ;;  %v3558_v6 = vld [vmem:[#allocation8 + $0xb4] sm:$0xf0]  ;;  %v2842_v26 = vor.u32 %v3626_v16, %v2841_v15  ;;  %v2603_v16 = vld [vmem:[#allocation8 + $0xf8] sm:$0xf0] }
  0x6f   :  { %1191 = vmatpush.bf16.msra.mxu1 %v2630_v9  ;;  %v3590_v9 = vld [vmem:[#allocation8 + $0x1b4] sm:$0xf0]  ;;  %v2570_v14 = vor.u32 %v3558_v6, %v2569_v5  ;;  %v2905_v5 = vld [vmem:[#allocation8 + $0x348] sm:$0xf] }
  0x70   :  { %1204 = vmatpush.bf16.msra.mxu2 %v2758_v24  ;;  %v3586_v24 = vld [vmem:[#allocation8 + $0x194] sm:$0xf0] }
  0x71   :  { %1217 = vmatpush.bf16.msra.mxu3 %v2886_v27  ;;  %v2682_v32 = vor.u32 %v3586_v24, %v2681_v23 }
  0x72   :  { %1179 = vmatpush.bf16.msra.mxu0 %v2486_v19  ;;  %v2698_v19 = vor.u32 %v3590_v9, %v2697_v8  ;;  %v3642_v8 = vld [vmem:[#allocation8 + $0x354] sm:$0xf0]  ;;  %v2489_v9 = vld [vmem:[#allocation8 + $0x8] sm:$0xf] }
  0x73   :  { %1192 = vmatpush.bf16.msra.mxu1 %v2614_v21  ;;  %v2553_v21 = vld [vmem:[#allocation8 + $0x88] sm:$0xf]  ;;  %v2906_v20 = vor.u32 %v3642_v8, %v2905_v5  ;;  %v2955_v8 = vld [vmem:[#allocation8 + $0x3b8] sm:$0xf0] }
  0x74   :  { %1205 = vmatpush.bf16.msra.mxu2 %v2742_v30  ;;  %v2554_v29 = vor.u32 %v3554_v22, %v2553_v21  ;;  %v2825_v30 = vld [vmem:[#allocation8 + $0x2a8] sm:$0xf]  ;;  %v3606_v22 = vld [vmem:[#allocation8 + $0x234] sm:$0xf0] }
  0x75   :  { %1218 = vmatpush.bf16.msra.mxu3 %v2870_v33  ;;  %v2953_v33 = vld [vmem:[#allocation8 + $0x3a8] sm:$0xf] }
  0x76   :  { %v2954_v40 = vor.u32 %v3654_v34, %v2953_v33  ;;  %v2761_v21 = vld [vmem:[#allocation8 + $0x228] sm:$0xf]  ;;  %v2715_v33 = vld [vmem:[#allocation8 + $0x1d8] sm:$0xf0] }
  0xb2   :  { %v290_v37 = vpop.f32.mrf.mxu0 }
  0xb3   :  { %v291_v38 = vadd.f32 %v290_v37, %v113_v35  ;;  %v303_v39 = vpop.f32.mrf.mxu1  ;;  %v2537_v35 = vld [vmem:[#allocation8 + $0x68] sm:$0xf] }
  0xb4   :  { %v304_v42 = vadd.f32 %v303_v39, %v114_v36  ;;  %v3550_v36 = vld [vmem:[#allocation8 + $0x74] sm:$0xf0]  ;;  %v2665_v37 = vld [vmem:[#allocation8 + $0x168] sm:$0xf]  ;;  %v2826_v39 = vor.u32 %v3622_v31, %v2825_v30  ;;  %v2762_v30 = vor.u32 %v3606_v22, %v2761_v21  ;;  %v2587_v31 = vld [vmem:[#allocation8 + $0xd8] sm:$0xf0] }
  0xb5   :  { %v333_v45 = vmax.f32 %v291_v38, 0.0  ;;  %v3582_v38 = vld [vmem:[#allocation8 + $0x174] sm:$0xf0]  ;;  %v2538_v43 = vor.u32 %v3550_v36, %v2537_v35  ;;  %v2745_v35 = vld [vmem:[#allocation8 + $0x208] sm:$0xf] }
  0xb6   :  { %v334_v46 = vmax.f32 %v304_v42, 0.0  ;;  %v3618_v42 = vld [vmem:[#allocation8 + $0x294] sm:$0xf0]  ;;  %v2666_v44 = vor.u32 %v3582_v38, %v2665_v37  ;;  %v2873_v37 = vld [vmem:[#allocation8 + $0x308] sm:$0xf] }
  0xb7   :  { %v3970_v49 = vpack.c.bf16 %v333_v45, %v333_v45  ;;  %v2937_v45 = vld [vmem:[#allocation8 + $0x388] sm:$0xf]  ;;  %v2810_v52 = vor.u32 %v3618_v42, %v2809_v41  ;;  %v3602_v36 = vld [vmem:[#allocation8 + $0x214] sm:$0xf0]  ;;  %v3648_v21 = vld [vmem:[#allocation8 + $0x38c] sm:$0xf] }
  0xb8   :  { %v3972_v54 = vpack.c.bf16 %v334_v46, %v334_v46  ;;  %v3650_v46 = vld [vmem:[#allocation8 + $0x394] sm:$0xf0]  ;;  %v2939_v22 = vld [vmem:[#allocation8 + $0x398] sm:$0xf0] }
  0xb9   :  { %1128 = vmatmul.bf16.vlgmr.msrb.gmra.mxu0 %v3970_v49  ;;  %v2938_v53 = vor.u32 %v3650_v46, %v2937_v45  ;;  %v3634_v38 = vld [vmem:[#allocation8 + $0x314] sm:$0xf0]  ;;  %v3556_v45 = vld [vmem:[#allocation8 + $0xac] sm:$0xf]  ;;  %v2746_v46 = vor.u32 %v3602_v36, %v2745_v35  ;;  %v2507_v36 = vld [vmem:[#allocation8 + $0x38] sm:$0xf0] }
  0xba   :  { %v316_v57 = vpop.f32.mrf.mxu2  ;;  %1141 = vmatmul.bf16.vlgmr.msrb.gmra.mxu1 %v3972_v54  ;;  %1224 = vmatpush.bf16.msrb.mxu0 %v2602_v48  ;;  %v292_v60 = vpop.f32.mrf.mxu0  ;;  %v3546_v48 = vld [vmem:[#allocation8 + $0x54] sm:$0xf0]  ;;  %v3540_v35 = vld [vmem:[#allocation8 + $0x2c] sm:$0xf] }
  0xbb   :  { %v317_v58 = vadd.f32 %v316_v57, %v115_v47  ;;  %v329_v59 = vpop.f32.mrf.mxu3  ;;  %1237 = vmatpush.bf16.msrb.mxu1 %v2730_v51  ;;  %v305_v2 = vpop.f32.mrf.mxu1  ;;  %v2521_v47 = vld [vmem:[#allocation8 + $0x48] sm:$0xf]  ;;  %v3578_v51 = vld [vmem:[#allocation8 + $0x154] sm:$0xf0] }
  0xbc   :  { %v330_v1 = vadd.f32 %v329_v59, %v116_v50  ;;  %v2649_v50 = vld [vmem:[#allocation8 + $0x148] sm:$0xf]  ;;  %v2522_v57 = vor.u32 %v3546_v48, %v2521_v47  ;;  %v3646_v60 = vld [vmem:[#allocation8 + $0x374] sm:$0xf0]  ;;  %v2571_v47 = vld [vmem:[#allocation8 + $0xb8] sm:$0xf0] }
  0xbd   :  { %v335_v7 = vmax.f32 %v317_v58, 0.0  ;;  %v2650_v58 = vor.u32 %v3578_v51, %v2649_v50  ;;  %v2921_v59 = vld [vmem:[#allocation8 + $0x368] sm:$0xf]  ;;  %v3588_v48 = vld [vmem:[#allocation8 + $0x1ac] sm:$0xf]  ;;  %v2874_v51 = vor.u32 %v3634_v38, %v2873_v37 }
  0xbe   :  { %v336_v10 = vmax.f32 %v330_v1, 0.0  ;;  %1225 = vmatpush.bf16.msrb.mxu0 %v2586_v61  ;;  %v2505_v61 = vld [vmem:[#allocation8 + $0x28] sm:$0xf]  ;;  %v2794_v1 = vor.u32 %v3614_v56, %v2793_v55  ;;  %v2922_v2 = vor.u32 %v3646_v60, %v2921_v59  ;;  %v2699_v50 = vld [vmem:[#allocation8 + $0x1b8] sm:$0xf0] }
  0xbf   :  { %v3976_v12 = vpack.c.bf16 %v335_v7, %v335_v7  ;;  %1238 = vmatpush.bf16.msrb.mxu1 %v2714_v3  ;;  %v2777_v3 = vld [vmem:[#allocation8 + $0x248] sm:$0xf]  ;;  %v2506_v6 = vor.u32 %v3542_v62, %v2505_v61  ;;  %v2634_v7 = vor.u32 %v3574_v0, %v2633_v63  ;;  %v3624_v55 = vld [vmem:[#allocation8 + $0x2cc] sm:$0xf]  ;;  %v2843_v56 = vld [vmem:[#allocation8 + $0x2d8] sm:$0xf0] }
  0xc0   :  { %v3978_v18 = vpack.c.bf16 %v336_v10, %v336_v10  ;;  %v3538_v10 = vld [vmem:[#allocation8 + $0x14] sm:$0xf0]  ;;  %v2778_v15 = vor.u32 %v3610_v4, %v2777_v3  ;;  %v3656_v59 = vld [vmem:[#allocation8 + $0x3cc] sm:$0xf]  ;;  %v2971_v60 = vld [vmem:[#allocation8 + $0x3d8] sm:$0xf0] }
  0xc1   :  { %1154 = vmatmul.bf16.vlgmr.msrb.gmra.mxu2 %v3976_v12  ;;  %v2490_v23 = vor.u32 %v3538_v10, %v2489_v9  ;;  %v3552_v61 = vld [vmem:[#allocation8 + $0x8c] sm:$0xf]  ;;  %v2555_v62 = vld [vmem:[#allocation8 + $0x98] sm:$0xf0] }
  0xc2   :  { %1167 = vmatmul.bf16.vlgmr.msrb.gmra.mxu3 %v3978_v18  ;;  %1250 = vmatpush.bf16.msrb.mxu2 %v2858_v11  ;;  %v318_v25 = vpop.f32.mrf.mxu2  ;;  %v2617_v11 = vld [vmem:[#allocation8 + $0x108] sm:$0xf]  ;;  %v3584_v63 = vld [vmem:[#allocation8 + $0x18c] sm:$0xf]  ;;  %v2683_v0 = vld [vmem:[#allocation8 + $0x198] sm:$0xf0]  ;;  %v2558_v5 = vor.u32 %v3552_v61, %v2555_v62 }
  0xc3   :  { %1263 = vmatpush.bf16.msrb.mxu3 %v2986_v13  ;;  %v331_v27 = vpop.f32.mrf.mxu3  ;;  %1226 = vmatpush.bf16.msrb.mxu0 %v2570_v14  ;;  %v3570_v13 = vld [vmem:[#allocation8 + $0x114] sm:$0xf0]  ;;  %v3564_v14 = vld [vmem:[#allocation8 + $0xec] sm:$0xf]  ;;  %v2889_v25 = vld [vmem:[#allocation8 + $0x328] sm:$0xf] }
  0xc4   :  { %1239 = vmatpush.bf16.msrb.mxu1 %v2698_v19  ;;  %v2731_v19 = vld [vmem:[#allocation8 + $0x1f8] sm:$0xf0]  ;;  %v2618_v24 = vor.u32 %v3570_v13, %v2617_v11  ;;  %v2606_v27 = vor.u32 %v3564_v14, %v2603_v16  ;;  %v3620_v3 = vld [vmem:[#allocation8 + $0x2ac] sm:$0xf] }
  0xc5   :  { %v2827_v4 = vld [vmem:[#allocation8 + $0x2b8] sm:$0xf0]  ;;  %v3548_v9 = vld [vmem:[#allocation8 + $0x6c] sm:$0xf] }
  0xc6   :  { %1251 = vmatpush.bf16.msrb.mxu2 %v2842_v26  ;;  %v3638_v26 = vld [vmem:[#allocation8 + $0x334] sm:$0xf0]  ;;  %v2539_v10 = vld [vmem:[#allocation8 + $0x78] sm:$0xf0]  ;;  %v3580_v11 = vld [vmem:[#allocation8 + $0x16c] sm:$0xf]  ;;  %v2830_v14 = vor.u32 %v3620_v3, %v2827_v4 }
  0xc7   :  { %1264 = vmatpush.bf16.msrb.mxu3 %v2970_v28  ;;  %1227 = vmatpush.bf16.msrb.mxu0 %v2554_v29  ;;  %v2734_v28 = vor.u32 %v3596_v17, %v2731_v19  ;;  %v3560_v29 = vld [vmem:[#allocation8 + $0xcc] sm:$0xf]  ;;  %v2890_v34 = vor.u32 %v3638_v26, %v2889_v25  ;;  %v2667_v13 = vld [vmem:[#allocation8 + $0x178] sm:$0xf0]  ;;  %v2542_v19 = vor.u32 %v3548_v9, %v2539_v10 }
  0xc8   :  { %1240 = vmatpush.bf16.msrb.mxu1 %v2682_v32  ;;  %v3592_v32 = vld [vmem:[#allocation8 + $0x1cc] sm:$0xf]  ;;  %v2590_v41 = vor.u32 %v3560_v29, %v2587_v31  ;;  %v2811_v17 = vld [vmem:[#allocation8 + $0x298] sm:$0xf0] }
  0xc9   :  { %1180 = vmatmul.bf16.vlgmr.msra.gmra.mxu0 %v3970_v49  ;;  %v2718_v42 = vor.u32 %v3592_v32, %v2715_v33  ;;  %v3616_v16 = vld [vmem:[#allocation8 + $0x28c] sm:$0xf]  ;;  %v2651_v26 = vld [vmem:[#allocation8 + $0x158] sm:$0xf0] }
  0xca   :  { %1252 = vmatpush.bf16.msrb.mxu2 %v2826_v39  ;;  %1193 = vmatmul.bf16.vlgmr.msra.gmra.mxu1 %v3972_v54  ;;  %v3628_v39 = vld [vmem:[#allocation8 + $0x2ec] sm:$0xf]  ;;  %v2635_v38 = vld [vmem:[#allocation8 + $0x138] sm:$0xf0] }
  0xcb   :  { %1265 = vmatpush.bf16.msrb.mxu3 %v2954_v40  ;;  %1228 = vmatpush.bf16.msrb.mxu0 %v2538_v43  ;;  %v2859_v40 = vld [vmem:[#allocation8 + $0x2f8] sm:$0xf0]  ;;  %v3660_v43 = vld [vmem:[#allocation8 + $0x3ec] sm:$0xf] }
  0xcc   :  { %1241 = vmatpush.bf16.msrb.mxu1 %v2666_v44  ;;  %v2987_v44 = vld [vmem:[#allocation8 + $0x3f8] sm:$0xf0]  ;;  %v3576_v25 = vld [vmem:[#allocation8 + $0x14c] sm:$0xf] }
  0xcd   :  { %v3612_v29 = vld [vmem:[#allocation8 + $0x26c] sm:$0xf]  ;;  %v2654_v32 = vor.u32 %v3576_v25, %v2651_v26  ;;  %v2747_v10 = vld [vmem:[#allocation8 + $0x218] sm:$0xf0]  ;;  %v3345_v26 = vld [vmem:[#allocation8 + $0x6c0] sm:$0xf] }
  0xce   :  { %1253 = vmatpush.bf16.msrb.mxu2 %v2810_v52  ;;  %v2862_v52 = vor.u32 %v3628_v39, %v2859_v40  ;;  %v3644_v33 = vld [vmem:[#allocation8 + $0x36c] sm:$0xf] }
  0xcf   :  { %1266 = vmatpush.bf16.msrb.mxu3 %v2938_v53  ;;  %1229 = vmatpush.bf16.msrb.mxu0 %v2522_v57  ;;  %v2990_v53 = vor.u32 %v3660_v43, %v2987_v44  ;;  %v2574_v57 = vor.u32 %v3556_v45, %v2571_v47  ;;  %v3572_v37 = vld [vmem:[#allocation8 + $0x12c] sm:$0xf]  ;;  %v2510_v44 = vor.u32 %v3540_v35, %v2507_v36  ;;  %v3677_v35 = vld [vmem:[#allocation8 + $0x46c] sm:$0xf0] }
  0xd0   :  { %1242 = vmatpush.bf16.msrb.mxu1 %v2650_v58  ;;  %v2702_v58 = vor.u32 %v3588_v48, %v2699_v50  ;;  %v3640_v43 = vld [vmem:[#allocation8 + $0x34c] sm:$0xf]  ;;  %v2638_v45 = vor.u32 %v3572_v37, %v2635_v38  ;;  %v2491_v48 = vld [vmem:[#allocation8 + $0x18] sm:$0xf0]  ;;  %v3169_v37 = vld [vmem:[#allocation8 + $0x560] sm:$0xf] }
  0xd1   :  { %1206 = vmatmul.bf16.vlgmr.msra.gmra.mxu2 %v3976_v12  ;;  %v3536_v47 = vld [vmem:[#allocation8 + $0xc] sm:$0xf]  ;;  %v3709_v38 = vld [vmem:[#allocation8 + $0x56c] sm:$0xf0] }
  0xd2   :  { %1219 = vmatmul.bf16.vlgmr.msra.gmra.mxu3 %v3978_v18  ;;  %1254 = vmatpush.bf16.msrb.mxu2 %v2794_v1  ;;  %v2846_v1 = vor.u32 %v3624_v55, %v2843_v56  ;;  %v3568_v50 = vld [vmem:[#allocation8 + $0x10c] sm:$0xf]  ;;  %v3693_v55 = vld [vmem:[#allocation8 + $0x4ec] sm:$0xf0]  ;;  %v3233_v56 = vld [vmem:[#allocation8 + $0x5e0] sm:$0xf]  ;;  %v2494_v61 = vor.u32 %v3536_v47, %v2491_v48 }
  0xd3   :  { %1267 = vmatpush.bf16.msrb.mxu3 %v2922_v2  ;;  %1230 = vmatpush.bf16.msrb.mxu0 %v2506_v6  ;;  %v2974_v2 = vor.u32 %v3656_v59, %v2971_v60  ;;  %v2686_v6 = vor.u32 %v3584_v63, %v2683_v0  ;;  %v3604_v59 = vld [vmem:[#allocation8 + $0x22c] sm:$0xf]  ;;  %v2763_v60 = vld [vmem:[#allocation8 + $0x238] sm:$0xf0]  ;;  %v2993_v48 = vld [vmem:[#allocation8 + $0x400] sm:$0xf] }
  0xd4   :  { %1243 = vmatpush.bf16.msrb.mxu1 %v2634_v7  ;;  %v3652_v7 = vld [vmem:[#allocation8 + $0x3ac] sm:$0xf]  ;;  %v2891_v0 = vld [vmem:[#allocation8 + $0x338] sm:$0xf0]  ;;  %v2766_v4 = vor.u32 %v3604_v59, %v2763_v60  ;;  %v3683_v59 = vld [vmem:[#allocation8 + $0x4a4] sm:$0xf] }
  0xd5   :  { %v3636_v63 = vld [vmem:[#allocation8 + $0x32c] sm:$0xf]  ;;  %v3075_v60 = vld [vmem:[#allocation8 + $0x4b0] sm:$0xf0] }
  0xd6   :  { %1255 = vmatpush.bf16.msrb.mxu2 %v2778_v15  ;;  %v2958_v15 = vor.u32 %v3652_v7, %v2955_v8  ;;  %v3721_v7 = vld [vmem:[#allocation8 + $0x5cc] sm:$0xf0]  ;;  %v2894_v8 = vor.u32 %v3636_v63, %v2891_v0  ;;  %v3600_v9 = vld [vmem:[#allocation8 + $0x20c] sm:$0xf]  ;;  %v3329_v0 = vld [vmem:[#allocation8 + $0x6a0] sm:$0xf] }
  0xd7   :  { %1268 = vmatpush.bf16.msrb.mxu3 %v2906_v20  ;;  %1231 = vmatpush.bf16.msrb.mxu0 %v2490_v23  ;;  %v2670_v20 = vor.u32 %v3580_v11, %v2667_v13  ;;  %v3544_v23 = vld [vmem:[#allocation8 + $0x4c] sm:$0xf]  ;;  %v2875_v13 = vld [vmem:[#allocation8 + $0x318] sm:$0xf0]  ;;  %v3701_v63 = vld [vmem:[#allocation8 + $0x52c] sm:$0xf0] }
  0xd8   :  { %1244 = vmatpush.bf16.msrb.mxu1 %v2618_v24  ;;  %v2523_v24 = vld [vmem:[#allocation8 + $0x58] sm:$0xf0]  ;;  %v3632_v11 = vld [vmem:[#allocation8 + $0x30c] sm:$0xf] }
  0xd9   :  { %v2526_v31 = vor.u32 %v3544_v23, %v2523_v24  ;;  %v3201_v23 = vld [vmem:[#allocation8 + $0x5a0] sm:$0xf]  ;;  %v3717_v24 = vld [vmem:[#allocation8 + $0x5ac] sm:$0xf0] }
  0xda   :  { %1256 = vmatpush.bf16.msrb.mxu2 %v2762_v30  ;;  %1232 = vmatmul.bf16.vlgmr.msrb.gmra.mxu0 %v3970_v49  ;;  %v2795_v30 = vld [vmem:[#allocation8 + $0x278] sm:$0xf0] }
  0xdb   :  { %1276 = vmatpush.bf16.msra.mxu0 %v2606_v27  ;;  %1269 = vmatpush.bf16.msrb.mxu3 %v2890_v34  ;;  %v2814_v27 = vor.u32 %v3616_v16, %v2811_v17  ;;  %v2923_v34 = vld [vmem:[#allocation8 + $0x378] sm:$0xf0]  ;;  %v2798_v39 = vor.u32 %v3612_v29, %v2795_v30  ;;  %v3057_v29 = vld [vmem:[#allocation8 + $0x480] sm:$0xf]  ;;  %v3681_v30 = vld [vmem:[#allocation8 + $0x48c] sm:$0xf0] }
  0xdc   :  { %1289 = vmatpush.bf16.msra.mxu1 %v2734_v28  ;;  %v2942_v28 = vor.u32 %v3648_v21, %v2939_v22  ;;  %v2926_v40 = vor.u32 %v3644_v33, %v2923_v34  ;;  %v3685_v21 = vld [vmem:[#allocation8 + $0x4ac] sm:$0xf0]  ;;  %v2878_v22 = vor.u32 %v3632_v11, %v2875_v13  ;;  %v3058_v34 = vor.u32 %v3681_v30, %v3057_v29  ;;  %v3281_v30 = vld [vmem:[#allocation8 + $0x640] sm:$0xf] }
  0xdd   :  { %1245 = vmatmul.bf16.vlgmr.msrb.gmra.mxu1 %v3972_v54  ;;  %v3713_v33 = vld [vmem:[#allocation8 + $0x58c] sm:$0xf0] }
  0xde   :  { %1257 = vmatpush.bf16.msrb.mxu2 %v2746_v46  ;;  %v2907_v46 = vld [vmem:[#allocation8 + $0x358] sm:$0xf0]  ;;  %v3745_v11 = vld [vmem:[#allocation8 + $0x68c] sm:$0xf0] }
  0xdf   :  { %1277 = vmatpush.bf16.msra.mxu0 %v2590_v41  ;;  %1270 = vmatpush.bf16.msrb.mxu3 %v2874_v51  ;;  %v3608_v41 = vld [vmem:[#allocation8 + $0x24c] sm:$0xf]  ;;  %v2619_v51 = vld [vmem:[#allocation8 + $0x118] sm:$0xf0] }
  0xe0   :  { %1290 = vmatpush.bf16.msra.mxu1 %v2718_v42  ;;  %v2779_v42 = vld [vmem:[#allocation8 + $0x258] sm:$0xf0]  ;;  %v2622_v62 = vor.u32 %v3568_v50, %v2619_v51  ;;  %v3665_v50 = vld [vmem:[#allocation8 + $0x40c] sm:$0xf0]  ;;  %v3691_v51 = vld [vmem:[#allocation8 + $0x4e4] sm:$0xf] }
  0xe1   :  { %1258 = vmatmul.bf16.vlgmr.msrb.gmra.mxu2 %v3976_v12 }
  0xe2   :  { %1302 = vmatpush.bf16.msra.mxu2 %v2862_v52  ;;  %1271 = vmatmul.bf16.vlgmr.msrb.gmra.mxu3 %v3978_v18  ;;  %v3105_v52 = vld [vmem:[#allocation8 + $0x4e0] sm:$0xf] }
  0xe3   :  { %1315 = vmatpush.bf16.msra.mxu3 %v2990_v53  ;;  %1278 = vmatpush.bf16.msra.mxu0 %v2574_v57  ;;  %v2782_v53 = vor.u32 %v3608_v41, %v2779_v42  ;;  %v3725_v57 = vld [vmem:[#allocation8 + $0x5ec] sm:$0xf0]  ;;  %v3170_v42 = vor.u32 %v3709_v38, %v3169_v37  ;;  %v3265_v37 = vld [vmem:[#allocation8 + $0x620] sm:$0xf] }
  0xe4   :  { %1291 = vmatpush.bf16.msra.mxu1 %v2702_v58  ;;  %v2910_v58 = vor.u32 %v3640_v43, %v2907_v46  ;;  %v3234_v3 = vor.u32 %v3725_v57, %v3233_v56  ;;  %v3673_v41 = vld [vmem:[#allocation8 + $0x44c] sm:$0xf0]  ;;  %v3153_v43 = vld [vmem:[#allocation8 + $0x540] sm:$0xf]  ;;  %v3687_v56 = vld [vmem:[#allocation8 + $0x4c4] sm:$0xf] }
  0xe5   :  { %v3669_v46 = vld [vmem:[#allocation8 + $0x42c] sm:$0xf0]  ;;  %v3091_v57 = vld [vmem:[#allocation8 + $0x4d0] sm:$0xf0] }
  0xe6   :  { %1303 = vmatpush.bf16.msra.mxu2 %v2846_v1  ;;  %v3106_v1 = vor.u32 %v3693_v55, %v3105_v52  ;;  %v3107_v52 = vld [vmem:[#allocation8 + $0x4f0] sm:$0xf0]  ;;  %v3733_v38 = vld [vmem:[#allocation8 + $0x62c] sm:$0xf0] }
  0xe7   :  { %1316 = vmatpush.bf16.msra.mxu3 %v2974_v2  ;;  %1279 = vmatpush.bf16.msra.mxu0 %v2558_v5  ;;  %v3089_v2 = vld [vmem:[#allocation8 + $0x4c0] sm:$0xf]  ;;  %v3689_v5 = vld [vmem:[#allocation8 + $0x4cc] sm:$0xf0]  ;;  %v3110_v55 = vor.u32 %v3691_v51, %v3107_v52  ;;  %v3171_v51 = vld [vmem:[#allocation8 + $0x570] sm:$0xf0] }
  0xe8   :  { %1292 = vmatpush.bf16.msra.mxu1 %v2686_v6  ;;  %v3217_v6 = vld [vmem:[#allocation8 + $0x5c0] sm:$0xf]  ;;  %v3090_v16 = vor.u32 %v3689_v5, %v3089_v2  ;;  %v3749_v2 = vld [vmem:[#allocation8 + $0x6ac] sm:$0xf0] }
  0xe9   :  { %v3218_v17 = vor.u32 %v3721_v7, %v3217_v6  ;;  %v3330_v5 = vor.u32 %v3749_v2, %v3329_v0  ;;  %v3121_v7 = vld [vmem:[#allocation8 + $0x500] sm:$0xf]  ;;  %v3994_v2 = vld [vmem:[#allocation7 + $0x1] ss:$4 sm:$0xf] }
  0xea   :  { %1304 = vmatpush.bf16.msra.mxu2 %v2830_v14  ;;  %v3361_v14 = vld [vmem:[#allocation8 + $0x6e0] sm:$0xf] }
  0xeb   :  { %1317 = vmatpush.bf16.msra.mxu3 %v2958_v15  ;;  %1280 = vmatpush.bf16.msra.mxu0 %v2542_v19  ;;  %v3757_v15 = vld [vmem:[#allocation8 + $0x6ec] sm:$0xf0]  ;;  %v2750_v19 = vor.u32 %v3600_v9, %v2747_v10  ;;  %v3313_v9 = vld [vmem:[#allocation8 + $0x680] sm:$0xf] }
  0xec   :  { %1293 = vmatpush.bf16.msra.mxu1 %v2670_v20  ;;  %v3073_v20 = vld [vmem:[#allocation8 + $0x4a0] sm:$0xf]  ;;  %v3362_v25 = vor.u32 %v3757_v15, %v3361_v14  ;;  %v3314_v13 = vor.u32 %v3745_v11, %v3313_v9  ;;  %v3675_v14 = vld [vmem:[#allocation8 + $0x464] sm:$0xf]  ;;  %v3043_v15 = vld [vmem:[#allocation8 + $0x470] sm:$0xf0] }
  0xed   :  { %v3139_v9 = vld [vmem:[#allocation8 + $0x530] sm:$0xf0] }
  0xee   :  { %1305 = vmatpush.bf16.msra.mxu2 %v2814_v27  ;;  %v3753_v27 = vld [vmem:[#allocation8 + $0x6cc] sm:$0xf0] }
  0xef   :  { %1318 = vmatpush.bf16.msra.mxu3 %v2942_v28  ;;  %1281 = vmatpush.bf16.msra.mxu0 %v2526_v31  ;;  %v3074_v28 = vor.u32 %v3685_v21, %v3073_v20  ;;  %v3202_v31 = vor.u32 %v3717_v24, %v3201_v23  ;;  %v3297_v20 = vld [vmem:[#allocation8 + $0x660] sm:$0xf]  ;;  %v3741_v21 = vld [vmem:[#allocation8 + $0x66c] sm:$0xf0]  ;;  %v3671_v24 = vld [vmem:[#allocation8 + $0x444] sm:$0xf] }
  0xf0   :  { %1294 = vmatpush.bf16.msra.mxu1 %v2654_v32  ;;  %v3185_v32 = vld [vmem:[#allocation8 + $0x580] sm:$0xf]  ;;  %v3298_v23 = vor.u32 %v3741_v21, %v3297_v20  ;;  %v3695_v21 = vld [vmem:[#allocation8 + $0x504] sm:$0xf] }
  0xf1   :  { %v3186_v36 = vor.u32 %v3713_v33, %v3185_v32  ;;  %v3667_v33 = vld [vmem:[#allocation8 + $0x424] sm:$0xf] }
  0xf2   :  { %1306 = vmatpush.bf16.msra.mxu2 %v2798_v39 }
  0xf3   :  { %1319 = vmatpush.bf16.msra.mxu3 %v2926_v40  ;;  %1282 = vmatpush.bf16.msra.mxu0 %v2510_v44  ;;  %v3025_v40 = vld [vmem:[#allocation8 + $0x440] sm:$0xf]  ;;  %v3705_v44 = vld [vmem:[#allocation8 + $0x54c] sm:$0xf0] }
  0xf4   :  { %1295 = vmatpush.bf16.msra.mxu1 %v2638_v45  ;;  %v3009_v45 = vld [vmem:[#allocation8 + $0x420] sm:$0xf] }
  0xf5   :  { %v3010_v47 = vor.u32 %v3669_v46, %v3009_v45  ;;  %v3249_v45 = vld [vmem:[#allocation8 + $0x600] sm:$0xf]  ;;  %v3729_v46 = vld [vmem:[#allocation8 + $0x60c] sm:$0xf0] }
  0xf6   :  { %1307 = vmatpush.bf16.msra.mxu2 %v2782_v53  ;;  %v2994_v53 = vor.u32 %v3665_v50, %v2993_v48  ;;  %v3789_v48 = vld [vmem:[#allocation8 + $0x7ec] sm:$0xf0]  ;;  %v3707_v50 = vld [vmem:[#allocation8 + $0x564] sm:$0xf] }
  0xf7   :  { %1320 = vmatpush.bf16.msra.mxu3 %v2910_v58  ;;  %1283 = vmatpush.bf16.msra.mxu0 %v2494_v61  ;;  %v3094_v58 = vor.u32 %v3687_v56, %v3091_v57  ;;  %v3078_v61 = vor.u32 %v3683_v59, %v3075_v60  ;;  %v3363_v56 = vld [vmem:[#allocation8 + $0x6f0] sm:$0xf0]  ;;  %v3785_v59 = vld [vmem:[#allocation8 + $0x7cc] sm:$0xf0] }
  0xf8   :  { %1296 = vmatpush.bf16.msra.mxu1 %v2622_v62  ;;  %v3137_v62 = vld [vmem:[#allocation8 + $0x520] sm:$0xf] }
  0xfa   :  { %1308 = vmatpush.bf16.msra.mxu2 %v2766_v4  ;;  %1284 = vmatmul.bf16.vlgmr.msra.gmra.mxu0 %v3970_v49  ;;  %v3346_v49 = vor.u32 %v3753_v27, %v3345_v26  ;;  %v3059_v4 = vld [vmem:[#allocation8 + $0x490] sm:$0xf0]  ;;  %v3719_v26 = vld [vmem:[#allocation8 + $0x5c4] sm:$0xf] }
  0xfb   :  { %2116 = vmatpush.bf16.msrb.mxu0 %v3106_v1  ;;  %1321 = vmatpush.bf16.msra.mxu3 %v2894_v8  ;;  %v3138_v1 = vor.u32 %v3701_v63, %v3137_v62  ;;  %v3697_v8 = vld [vmem:[#allocation8 + $0x50c] sm:$0xf0]  ;;  %v3155_v62 = vld [vmem:[#allocation8 + $0x550] sm:$0xf0]  ;;  %v3751_v63 = vld [vmem:[#allocation8 + $0x6c4] sm:$0xf] }
  0xfc   :  { %2129 = vmatpush.bf16.msrb.mxu1 %v3234_v3  ;;  %v3679_v3 = vld [vmem:[#allocation8 + $0x484] sm:$0xf]  ;;  %v3122_v10 = vor.u32 %v3697_v8, %v3121_v7 }
  0xfd   :  { %1297 = vmatmul.bf16.vlgmr.msra.gmra.mxu1 %v3972_v54  ;;  %v3041_v54 = vld [vmem:[#allocation8 + $0x460] sm:$0xf]  ;;  %v3062_v6 = vor.u32 %v3679_v3, %v3059_v4  ;;  %v3699_v8 = vld [vmem:[#allocation8 + $0x524] sm:$0xf] }
  0xfe   :  { %1309 = vmatpush.bf16.msra.mxu2 %v2750_v19  ;;  %v3042_v39 = vor.u32 %v3677_v35, %v3041_v54  ;;  %v3235_v19 = vld [vmem:[#allocation8 + $0x5f0] sm:$0xf0]  ;;  %v3457_v4 = vld [vmem:[#allocation8 + $0x7a0] sm:$0xf] }
  0xff   :  { %2117 = vmatpush.bf16.msrb.mxu0 %v3090_v16  ;;  %1322 = vmatpush.bf16.msra.mxu3 %v2878_v22  ;;  %v3723_v16 = vld [vmem:[#allocation8 + $0x5e4] sm:$0xf]  ;;  %v3203_v35 = vld [vmem:[#allocation8 + $0x5b0] sm:$0xf0] }
 0x100   :  { %2130 = vmatpush.bf16.msrb.mxu1 %v3218_v17  ;;  %v3046_v17 = vor.u32 %v3675_v14, %v3043_v15  ;;  %v3238_v22 = vor.u32 %v3723_v16, %v3235_v19  ;;  %v3331_v14 = vld [vmem:[#allocation8 + $0x6b0] sm:$0xf0]  ;;  %v472_v15 = vperm.slane %v3994_v2, 0  ;;  %v3777_v19 = vld [vmem:[#allocation8 + $0x78c] sm:$0xf0] }
 0x101   :  { %1310 = vmatmul.bf16.vlgmr.msra.gmra.mxu2 %v3976_v12  ;;  %v3026_v12 = vor.u32 %v3673_v41, %v3025_v40  ;;  %v3663_v40 = vld [vmem:[#allocation8 + $0x404] sm:$0xf]  ;;  %v2995_v41 = vld [vmem:[#allocation8 + $0x410] sm:$0xf0] }
 0x102   :  { %2142 = vmatpush.bf16.msrb.mxu2 %v3362_v25  ;;  %1323 = vmatmul.bf16.vlgmr.msra.gmra.mxu3 %v3978_v18  ;;  %v3154_v18 = vor.u32 %v3705_v44, %v3153_v43  ;;  %v3027_v25 = vld [vmem:[#allocation8 + $0x450] sm:$0xf0]  ;;  %v2998_v43 = vor.u32 %v3663_v40, %v2995_v41 }
 0x103   :  { %2118 = vmatpush.bf16.msrb.mxu0 %v3074_v28  ;;  %v3030_v27 = vor.u32 %v3671_v24, %v3027_v25  ;;  %v3219_v28 = vld [vmem:[#allocation8 + $0x5d0] sm:$0xf0] }
 0x104   :  { %2131 = vmatpush.bf16.msrb.mxu1 %v3202_v31  ;;  %v3222_v29 = vor.u32 %v3719_v26, %v3219_v28  ;;  %v3737_v31 = vld [vmem:[#allocation8 + $0x64c] sm:$0xf0]  ;;  %v3187_v44 = vld [vmem:[#allocation8 + $0x590] sm:$0xf0]  ;;  %v3425_v28 = vld [vmem:[#allocation8 + $0x760] sm:$0xf] }
 0x105   :  { %v3282_v32 = vor.u32 %v3737_v31, %v3281_v30  ;;  %v3315_v25 = vld [vmem:[#allocation8 + $0x690] sm:$0xf0] }
 0x106   :  { %2143 = vmatpush.bf16.msrb.mxu2 %v3346_v49  ;;  %v3011_v49 = vld [vmem:[#allocation8 + $0x430] sm:$0xf0] }
 0x107   :  { %2119 = vmatpush.bf16.msrb.mxu0 %v3058_v34  ;;  %v3715_v34 = vld [vmem:[#allocation8 + $0x5a4] sm:$0xf]  ;;  %v3014_v54 = vor.u32 %v3667_v33, %v3011_v49  ;;  %v3299_v33 = vld [vmem:[#allocation8 + $0x670] sm:$0xf0] }
 0x108   :  { %2132 = vmatpush.bf16.msrb.mxu1 %v3186_v36  ;;  %v3206_v36 = vor.u32 %v3715_v34, %v3203_v35  ;;  %v3409_v35 = vld [vmem:[#allocation8 + $0x740] sm:$0xf] }
 0x10a   :  { %2144 = vmatpush.bf16.msrb.mxu2 %v3330_v5  ;;  %v3781_v5 = vld [vmem:[#allocation8 + $0x7ac] sm:$0xf0] }
 0x10b   :  { %2120 = vmatpush.bf16.msrb.mxu0 %v3042_v39  ;;  %v3266_v39 = vor.u32 %v3733_v38, %v3265_v37  ;;  %v3458_v7 = vor.u32 %v3781_v5, %v3457_v4  ;;  %v3735_v38 = vld [vmem:[#allocation8 + $0x644] sm:$0xf] }
 0x10c   :  { %2133 = vmatpush.bf16.msrb.mxu1 %v3170_v42  ;;  %v3711_v42 = vld [vmem:[#allocation8 + $0x584] sm:$0xf] }
 0x10e   :  { %2145 = vmatpush.bf16.msrb.mxu2 %v3314_v13  ;;  %v3142_v13 = vor.u32 %v3699_v8, %v3139_v9 }
 0x10f   :  { %2121 = vmatpush.bf16.msrb.mxu0 %v3026_v12  ;;  %v3190_v12 = vor.u32 %v3711_v42, %v3187_v44  ;;  %v3113_v44 = vld [vmem:[#allocation8 + $0x4e8] sm:$0xf] }
 0x110   :  { %2134 = vmatpush.bf16.msrb.mxu1 %v3154_v18  ;;  %v3489_v18 = vld [vmem:[#allocation8 + $0x7e0] sm:$0xf] }
 0x111   :  { %v3490_v52 = vor.u32 %v3789_v48, %v3489_v18 }
 0x112   :  { %2146 = vmatpush.bf16.msrb.mxu2 %v3298_v23  ;;  %v3743_v23 = vld [vmem:[#allocation8 + $0x684] sm:$0xf] }
 0x113   :  { %2122 = vmatpush.bf16.msrb.mxu0 %v3010_v47  ;;  %v3250_v47 = vor.u32 %v3729_v46, %v3249_v45  ;;  %2155 = vmatpush.bf16.msrb.mxu3 %v3490_v52  ;;  %v3765_v45 = vld [vmem:[#allocation8 + $0x72c] sm:$0xf0] }
 0x114   :  { %2135 = vmatpush.bf16.msrb.mxu1 %v3138_v1  ;;  %v3347_v1 = vld [vmem:[#allocation8 + $0x6d0] sm:$0xf0] }
 0x115   :  { %v3350_v3 = vor.u32 %v3751_v63, %v3347_v1  ;;  %v3251_v1 = vld [vmem:[#allocation8 + $0x610] sm:$0xf0] }
 0x116   :  { %2147 = vmatpush.bf16.msrb.mxu2 %v3282_v32  ;;  %v3739_v32 = vld [vmem:[#allocation8 + $0x664] sm:$0xf] }
 0x117   :  { %2123 = vmatpush.bf16.msrb.mxu0 %v2994_v53  ;;  %v3174_v53 = vor.u32 %v3707_v50, %v3171_v51  ;;  %v3302_v34 = vor.u32 %v3739_v32, %v3299_v33  ;;  %v3731_v50 = vld [vmem:[#allocation8 + $0x624] sm:$0xf]  ;;  %v3267_v51 = vld [vmem:[#allocation8 + $0x630] sm:$0xf0]  ;;  %v3678_v32 = vld [vmem:[#allocation8 + $0x474] sm:$0xf0] }
 0x118   :  { %2136 = vmatpush.bf16.msrb.mxu1 %v3122_v10  ;;  %v3747_v10 = vld [vmem:[#allocation8 + $0x6a4] sm:$0xf]  ;;  %v3241_v33 = vld [vmem:[#allocation8 + $0x5e8] sm:$0xf] }
 0x119   :  { %v3334_v16 = vor.u32 %v3747_v10, %v3331_v14  ;;  %v3081_v10 = vld [vmem:[#allocation8 + $0x4a8] sm:$0xf]  ;;  %v3686_v14 = vld [vmem:[#allocation8 + $0x4b4] sm:$0xf0] }
 0x11a   :  { %2148 = vmatpush.bf16.msrb.mxu2 %v3266_v39  ;;  %v3283_v39 = vld [vmem:[#allocation8 + $0x650] sm:$0xf0] }
 0x11b   :  { %2168 = vmatpush.bf16.msra.mxu0 %v3110_v55  ;;  %v3755_v55 = vld [vmem:[#allocation8 + $0x6e4] sm:$0xf]  ;;  %v3286_v41 = vor.u32 %v3735_v38, %v3283_v39 }
 0x11c   :  { %2181 = vmatpush.bf16.msra.mxu1 %v3238_v22  ;;  %v3366_v57 = vor.u32 %v3755_v55, %v3363_v56  ;;  %v3123_v22 = vld [vmem:[#allocation8 + $0x510] sm:$0xf0]  ;;  %v473_v56 = vperm.slane %v3994_v2, 1 }
 0x11d   :  { %v3126_v24 = vor.u32 %v3695_v21, %v3123_v22  ;;  %v3065_v21 = vld [vmem:[#allocation8 + $0x488] sm:$0xf] }
 0x11e   :  { %2149 = vmatpush.bf16.msrb.mxu2 %v3250_v47  ;;  %v3694_v47 = vld [vmem:[#allocation8 + $0x4f4] sm:$0xf0] }
 0x11f   :  { %2169 = vmatpush.bf16.msra.mxu0 %v3094_v58  ;;  %v3473_v58 = vld [vmem:[#allocation8 + $0x7c0] sm:$0xf] }
 0x120   :  { %2182 = vmatpush.bf16.msra.mxu1 %v3222_v29  ;;  %v3474_v60 = vor.u32 %v3785_v59, %v3473_v58  ;;  %v3773_v29 = vld [vmem:[#allocation8 + $0x76c] sm:$0xf0]  ;;  %v3114_v58 = vor.u32 %v3694_v47, %v3113_v44  ;;  %v3690_v59 = vld [vmem:[#allocation8 + $0x4d4] sm:$0xf0]  ;;  %v3225_v44 = vld [vmem:[#allocation8 + $0x5c8] sm:$0xf] }
 0x121   :  { %v3426_v31 = vor.u32 %v3773_v29, %v3425_v28  ;;  %v474_v47 = vperm.slane %v3994_v2, 2 }
 0x122   :  { %2194 = vmatpush.bf16.msra.mxu2 %v3366_v57  ;;  %2156 = vmatpush.bf16.msrb.mxu3 %v3474_v60  ;;  %v3097_v57 = vld [vmem:[#allocation8 + $0x4c8] sm:$0xf]  ;;  %v3377_v60 = vld [vmem:[#allocation8 + $0x700] sm:$0xf] }
 0x123   :  { %2170 = vmatpush.bf16.msra.mxu0 %v3078_v61  ;;  %v3703_v61 = vld [vmem:[#allocation8 + $0x544] sm:$0xf]  ;;  %v3098_v9 = vor.u32 %v3690_v59, %v3097_v57  ;;  %v3209_v57 = vld [vmem:[#allocation8 + $0x5a8] sm:$0xf] }
 0x124   :  { %2183 = vmatpush.bf16.msra.mxu1 %v3206_v36  ;;  %v3158_v0 = vor.u32 %v3703_v61, %v3155_v62  ;;  %v3769_v36 = vld [vmem:[#allocation8 + $0x74c] sm:$0xf0]  ;;  %v3767_v59 = vld [vmem:[#allocation8 + $0x744] sm:$0xf] }
 0x125   :  { %v3410_v37 = vor.u32 %v3769_v36, %v3409_v35  ;;  %v3761_v61 = vld [vmem:[#allocation8 + $0x70c] sm:$0xf0]  ;;  %v3443_v35 = vld [vmem:[#allocation8 + $0x790] sm:$0xf0] }
 0x126   :  { %2195 = vmatpush.bf16.msra.mxu2 %v3350_v3  ;;  %2157 = vmatpush.bf16.msrb.mxu3 %v3458_v7  ;;  %v3378_v63 = vor.u32 %v3761_v61, %v3377_v60  ;;  %v3787_v3 = vld [vmem:[#allocation8 + $0x7e4] sm:$0xf]  ;;  %v3411_v60 = vld [vmem:[#allocation8 + $0x750] sm:$0xf0] }
 0x127   :  { %2171 = vmatpush.bf16.msra.mxu0 %v3062_v6 }
 0x128   :  { %2184 = vmatpush.bf16.msra.mxu1 %v3190_v12  ;;  %v3393_v12 = vld [vmem:[#allocation8 + $0x720] sm:$0xf] }
 0x129   :  { %v3394_v48 = vor.u32 %v3765_v45, %v3393_v12  ;;  %v3722_v45 = vld [vmem:[#allocation8 + $0x5d4] sm:$0xf0] }
 0x12a   :  { %2196 = vmatpush.bf16.msra.mxu2 %v3334_v16  ;;  %v3475_v16 = vld [vmem:[#allocation8 + $0x7d0] sm:$0xf0] }
 0x12b   :  { %2172 = vmatpush.bf16.msra.mxu0 %v3046_v17  ;;  %v3441_v17 = vld [vmem:[#allocation8 + $0x780] sm:$0xf] }
 0x12c   :  { %2185 = vmatpush.bf16.msra.mxu1 %v3174_v53  ;;  %v3442_v20 = vor.u32 %v3777_v19, %v3441_v17  ;;  %v3270_v53 = vor.u32 %v3731_v50, %v3267_v51 }
 0x12e   :  { %2158 = vmatpush.bf16.msrb.mxu3 %v3442_v20  ;;  %v3082_v20 = vor.u32 %v3686_v14, %v3081_v10  ;;  %v3395_v10 = vld [vmem:[#allocation8 + $0x730] sm:$0xf0]  ;;  %v3115_v14 = vld [vmem:[#allocation8 + $0x4f8] sm:$0xf0] }
 0x12f   :  { %2173 = vmatpush.bf16.msra.mxu0 %v3030_v27  ;;  %v3318_v27 = vor.u32 %v3743_v23, %v3315_v25  ;;  %v3682_v23 = vld [vmem:[#allocation8 + $0x494] sm:$0xf0]  ;;  %v3459_v25 = vld [vmem:[#allocation8 + $0x7b0] sm:$0xf0] }
 0x130   :  { %2186 = vmatpush.bf16.msra.mxu1 %v3158_v0  ;;  %v3727_v0 = vld [vmem:[#allocation8 + $0x604] sm:$0xf] }
 0x131   :  { %2197 = vmatpush.bf16.msra.mxu2 %v3318_v27  ;;  %v3254_v5 = vor.u32 %v3727_v0, %v3251_v1  ;;  %v3414_v0 = vor.u32 %v3767_v59, %v3411_v60  ;;  %v3321_v59 = vld [vmem:[#allocation8 + $0x688] sm:$0xf]  ;;  %v3746_v60 = vld [vmem:[#allocation8 + $0x694] sm:$0xf0] }
 0x132   :  { %2159 = vmatpush.bf16.msrb.mxu3 %v3426_v31  ;;  %v3049_v31 = vld [vmem:[#allocation8 + $0x468] sm:$0xf] }
 0x133   :  { %2174 = vmatpush.bf16.msra.mxu0 %v3014_v54 }
 0x134   :  { %2187 = vmatpush.bf16.msra.mxu1 %v3142_v13 }
 0x135   :  { %2198 = vmatpush.bf16.msra.mxu2 %v3302_v34  ;;  %v3726_v34 = vld [vmem:[#allocation8 + $0x5f4] sm:$0xf0] }
 0x136   :  { %v1129_v6 = vpop.f32.mrf.mxu0  ;;  %2160 = vmatpush.bf16.msrb.mxu3 %v3410_v37 }
 0x137   :  { %2175 = vmatpush.bf16.msra.mxu0 %v2998_v43  ;;  %v1142_v11 = vpop.f32.mrf.mxu1  ;;  %v1130_v26 = vadd.f32 %v1129_v6, %v472_v15  ;;  %v3491_v6 = vld [vmem:[#allocation8 + $0x7f0] sm:$0xf0]  ;;  %v3783_v15 = vld [vmem:[#allocation8 + $0x7c4] sm:$0xf] }
 0x138   :  { %2188 = vmatpush.bf16.msra.mxu1 %v3126_v24  ;;  %v3494_v8 = vor.u32 %v3787_v3, %v3491_v6  ;;  %v3478_v19 = vor.u32 %v3783_v15, %v3475_v16  ;;  %v3779_v24 = vld [vmem:[#allocation8 + $0x7a4] sm:$0xf]  ;;  %v3666_v6 = vld [vmem:[#allocation8 + $0x414] sm:$0xf0] }
 0x139   :  { %v1143_v54 = vadd.f32 %v1142_v11, %v1130_v26  ;;  %2199 = vmatpush.bf16.msra.mxu2 %v3286_v41  ;;  %v3462_v27 = vor.u32 %v3779_v24, %v3459_v25  ;;  %v3242_v41 = vor.u32 %v3726_v34, %v3241_v33  ;;  %v3369_v25 = vld [vmem:[#allocation8 + $0x6e8] sm:$0xf] }
 0x13a   :  { %2161 = vmatpush.bf16.msrb.mxu3 %v3394_v48 }
 0x13d   :  { %2200 = vmatpush.bf16.msra.mxu2 %v3270_v53  ;;  %v3226_v53 = vor.u32 %v3722_v45, %v3225_v44 }
 0x13e   :  { %v1131_v30 = vpop.f32.mrf.mxu0  ;;  %2162 = vmatpush.bf16.msrb.mxu3 %v3378_v63 }
 0x13f   :  { %v1144_v49 = vpop.f32.mrf.mxu1  ;;  %v3066_v30 = vor.u32 %v3682_v23, %v3065_v21  ;;  %v3710_v23 = vld [vmem:[#allocation8 + $0x574] sm:$0xf0] }
 0x141   :  { %2201 = vmatpush.bf16.msra.mxu2 %v3254_v5  ;;  %v3001_v5 = vld [vmem:[#allocation8 + $0x408] sm:$0xf] }
 0x142   :  { %2207 = vmatpush.bf16.msra.mxu3 %v3494_v8  ;;  %v3714_v8 = vld [vmem:[#allocation8 + $0x594] sm:$0xf0] }
 0x144   :  { %v1155_v40 = vpop.f32.mrf.mxu2 }
 0x145   :  { %v1156_v42 = vadd.f32 %v1155_v40, %v1143_v54  ;;  %v1168_v43 = vpop.f32.mrf.mxu3  ;;  %v3775_v54 = vld [vmem:[#allocation8 + $0x784] sm:$0xf]  ;;  %v3050_v40 = vor.u32 %v3678_v32, %v3049_v31  ;;  %v3099_v31 = vld [vmem:[#allocation8 + $0x4d8] sm:$0xf0] }
 0x146   :  { %v1181_v18 = vpop.f32.mrf.mxu0  ;;  %2208 = vmatpush.bf16.msra.mxu3 %v3478_v19  ;;  %v3446_v37 = vor.u32 %v3775_v54, %v3443_v35  ;;  %v3161_v35 = vld [vmem:[#allocation8 + $0x548] sm:$0xf] }
 0x147   :  { %v1169_v46 = vadd.f32 %v1168_v43, %v1156_v42  ;;  %v1194_v52 = vpop.f32.mrf.mxu1  ;;  %v1182_v11 = vadd.f32 %v1181_v18, %v473_v56  ;;  %v3033_v42 = vld [vmem:[#allocation8 + $0x448] sm:$0xf]  ;;  %v3674_v43 = vld [vmem:[#allocation8 + $0x454] sm:$0xf0]  ;;  %v3427_v18 = vld [vmem:[#allocation8 + $0x770] sm:$0xf0] }
 0x148   :  { %v3670_v56 = vld [vmem:[#allocation8 + $0x434] sm:$0xf0] }
 0x149   :  { %v1328_v55 = vmax.f32 %v1169_v46, 0.0  ;;  %v1195_v22 = vadd.f32 %v1194_v52, %v1182_v11  ;;  %v3771_v46 = vld [vmem:[#allocation8 + $0x764] sm:$0xf]  ;;  %v3034_v52 = vor.u32 %v3674_v43, %v3033_v42 }
 0x14a   :  { %2209 = vmatpush.bf16.msra.mxu3 %v3462_v27  ;;  %v3430_v50 = vor.u32 %v3771_v46, %v3427_v18  ;;  %v3379_v27 = vld [vmem:[#allocation8 + $0x710] sm:$0xf0]  ;;  %v3145_v18 = vld [vmem:[#allocation8 + $0x528] sm:$0xf] }
 0x14b   :  { %v3998_v62 = vpack.c.bf16 %v1328_v55, %v1328_v55  ;;  %v3017_v55 = vld [vmem:[#allocation8 + $0x428] sm:$0xf] }
 0x14c   :  { %v1157_v4 = vpop.f32.mrf.mxu2  ;;  %v3018_v3 = vor.u32 %v3670_v56, %v3017_v55 }
 0x14d   :  { %v1170_v7 = vpop.f32.mrf.mxu3  ;;  %2124 = vmatmul.bf16.vlgmr.msrb.gmra.mxu0 %v3998_v62 }
 0x14e   :  { %2220 = vmatpush.bf16.msrb.mxu0 %v3114_v58  ;;  %v1183_v13 = vpop.f32.mrf.mxu0  ;;  %2210 = vmatpush.bf16.msra.mxu3 %v3446_v37  ;;  %v3718_v58 = vld [vmem:[#allocation8 + $0x5b4] sm:$0xf0]  ;;  %v3193_v7 = vld [vmem:[#allocation8 + $0x588] sm:$0xf] }
 0x14f   :  { %v1196_v17 = vpop.f32.mrf.mxu1  ;;  %v3210_v4 = vor.u32 %v3718_v58, %v3209_v57  ;;  %v3692_v13 = vld [vmem:[#allocation8 + $0x4ec] sm:$0xf]  ;;  %v3194_v21 = vor.u32 %v3714_v8, %v3193_v7  ;;  %v3353_v37 = vld [vmem:[#allocation8 + $0x6c8] sm:$0xf]  ;;  %v3698_v58 = vld [vmem:[#allocation8 + $0x514] sm:$0xf0]  ;;  %v3322_v7 = vor.u32 %v3746_v60, %v3321_v59 }
 0x150   :  { %v3118_v24 = vor.u32 %v3692_v13, %v3115_v14  ;;  %v3129_v57 = vld [vmem:[#allocation8 + $0x508] sm:$0xf]  ;;  %v3672_v13 = vld [vmem:[#allocation8 + $0x44c] sm:$0xf]  ;;  %v3035_v14 = vld [vmem:[#allocation8 + $0x458] sm:$0xf0] }
 0x151   :  { %v3481_v60 = vld [vmem:[#allocation8 + $0x7c8] sm:$0xf] }
 0x152   :  { %2221 = vmatpush.bf16.msrb.mxu0 %v3098_v9  ;;  %2211 = vmatpush.bf16.msra.mxu3 %v3430_v50  ;;  %v3763_v9 = vld [vmem:[#allocation8 + $0x724] sm:$0xf]  ;;  %v3750_v50 = vld [vmem:[#allocation8 + $0x6b4] sm:$0xf0] }
 0x153   :  { %v3398_v15 = vor.u32 %v3763_v9, %v3395_v10  ;;  %v3305_v9 = vld [vmem:[#allocation8 + $0x668] sm:$0xf] }
 0x154   :  { %v1207_v26 = vpop.f32.mrf.mxu2 }
 0x155   :  { %v1208_v28 = vadd.f32 %v1207_v26, %v1195_v22  ;;  %v1220_v29 = vpop.f32.mrf.mxu3  ;;  %v3177_v22 = vld [vmem:[#allocation8 + $0x568] sm:$0xf]  ;;  %v3759_v26 = vld [vmem:[#allocation8 + $0x704] sm:$0xf] }
 0x156   :  { %2222 = vmatpush.bf16.msrb.mxu0 %v3082_v20  ;;  %2212 = vmatpush.bf16.msra.mxu3 %v3414_v0  ;;  %v3002_v20 = vor.u32 %v3666_v6, %v3001_v5  ;;  %v3382_v32 = vor.u32 %v3759_v26, %v3379_v27  ;;  %v3130_v5 = vor.u32 %v3698_v58, %v3129_v57  ;;  %v475_v6 = vperm.slane %v3994_v2, 3  ;;  %v3716_v26 = vld [vmem:[#allocation8 + $0x5ac] sm:$0xf]  ;;  %v3211_v27 = vld [vmem:[#allocation8 + $0x5b8] sm:$0xf0] }
 0x157   :  { %v1221_v49 = vadd.f32 %v1220_v29, %v1208_v28  ;;  %v1233_v36 = vpop.f32.mrf.mxu0  ;;  %v3758_v29 = vld [vmem:[#allocation8 + $0x6f4] sm:$0xf0] }
 0x158   :  { %v1234_v61 = vadd.f32 %v1233_v36, %v474_v47  ;;  %v3370_v34 = vor.u32 %v3758_v29, %v3369_v25  ;;  %v3706_v36 = vld [vmem:[#allocation8 + $0x554] sm:$0xf0] }
 0x159   :  { %v1329_v38 = vmax.f32 %v1221_v49, 0.0  ;;  %v3178_v49 = vor.u32 %v3710_v23, %v3177_v22  ;;  %v3162_v44 = vor.u32 %v3706_v36, %v3161_v35  ;;  %v3702_v47 = vld [vmem:[#allocation8 + $0x534] sm:$0xf0]  ;;  %v3668_v23 = vld [vmem:[#allocation8 + $0x42c] sm:$0xf] }
 0x15a   :  { %v1246_v39 = vpop.f32.mrf.mxu1  ;;  %2223 = vmatpush.bf16.msrb.mxu0 %v3066_v30  ;;  %2213 = vmatpush.bf16.msra.mxu3 %v3398_v15  ;;  %v3688_v30 = vld [vmem:[#allocation8 + $0x4cc] sm:$0xf]  ;;  %v3738_v22 = vld [vmem:[#allocation8 + $0x654] sm:$0xf0] }
 0x15b   :  { %v4001_v12 = vpack.c.bf16 %v1329_v38, %v1329_v38  ;;  %v1247_v11 = vadd.f32 %v1246_v39, %v1234_v61  ;;  %v3102_v54 = vor.u32 %v3688_v30, %v3099_v31  ;;  %v3754_v39 = vld [vmem:[#allocation8 + $0x6d4] sm:$0xf0]  ;;  %v3676_v61 = vld [vmem:[#allocation8 + $0x46c] sm:$0xf]  ;;  %v3273_v31 = vld [vmem:[#allocation8 + $0x628] sm:$0xf] }
 0x15c   :  { %v1209_v48 = vpop.f32.mrf.mxu2  ;;  %v3354_v45 = vor.u32 %v3754_v39, %v3353_v37  ;;  %v3720_v15 = vld [vmem:[#allocation8 + $0x5cc] sm:$0xf]  ;;  %v3195_v37 = vld [vmem:[#allocation8 + $0x598] sm:$0xf0] }
 0x15d   :  { %v1222_v51 = vpop.f32.mrf.mxu3  ;;  %2137 = vmatmul.bf16.vlgmr.msrb.gmra.mxu1 %v4001_v12  ;;  %2176 = vmatmul.bf16.vlgmr.msra.gmra.mxu0 %v3998_v62  ;;  %v3337_v48 = vld [vmem:[#allocation8 + $0x6a8] sm:$0xf]  ;;  %v3712_v36 = vld [vmem:[#allocation8 + $0x58c] sm:$0xf] }
 0x15e   :  { %2224 = vmatpush.bf16.msrb.mxu0 %v3050_v40  ;;  %2233 = vmatpush.bf16.msrb.mxu1 %v3242_v41  ;;  %v3684_v40 = vld [vmem:[#allocation8 + $0x4ac] sm:$0xf]  ;;  %v3083_v41 = vld [vmem:[#allocation8 + $0x4b8] sm:$0xf0]  ;;  %v3338_v55 = vor.u32 %v3750_v50, %v3337_v48 }
 0x15f   :  { %v1235_v63 = vpop.f32.mrf.mxu0  ;;  %2214 = vmatpush.bf16.msra.mxu3 %v3382_v32  ;;  %v3086_v46 = vor.u32 %v3684_v40, %v3083_v41  ;;  %v3680_v51 = vld [vmem:[#allocation8 + $0x48c] sm:$0xf]  ;;  %v3179_v50 = vld [vmem:[#allocation8 + $0x578] sm:$0xf0] }
 0x160   :  { %v3051_v63 = vld [vmem:[#allocation8 + $0x478] sm:$0xf0]  ;;  %v3708_v48 = vld [vmem:[#allocation8 + $0x56c] sm:$0xf] }
 0x161   :  { %v3054_v8 = vor.u32 %v3676_v61, %v3051_v63  ;;  %v3182_v58 = vor.u32 %v3708_v48, %v3179_v50  ;;  %v3786_v61 = vld [vmem:[#allocation8 + $0x7d4] sm:$0xf0]  ;;  %v3704_v63 = vld [vmem:[#allocation8 + $0x54c] sm:$0xf]  ;;  %v3499_v48 = vld [vmem:[#allocation8 + $0x7f8] sm:$0xf0] }
 0x162   :  { %v1248_v1 = vpop.f32.mrf.mxu1  ;;  %2225 = vmatpush.bf16.msrb.mxu0 %v3034_v52  ;;  %2234 = vmatpush.bf16.msrb.mxu1 %v3226_v53  ;;  %v3067_v52 = vld [vmem:[#allocation8 + $0x498] sm:$0xf0]  ;;  %v3146_v53 = vor.u32 %v3702_v47, %v3145_v18  ;;  %v3497_v18 = vld [vmem:[#allocation8 + $0x7e8] sm:$0xf]  ;;  %v3790_v47 = vld [vmem:[#allocation8 + $0x7f4] sm:$0xf0] }
 0x163   :  { %v3070_v56 = vor.u32 %v3680_v51, %v3067_v52  ;;  %v3724_v1 = vld [vmem:[#allocation8 + $0x5ec] sm:$0xf]  ;;  %v3371_v52 = vld [vmem:[#allocation8 + $0x6f8] sm:$0xf0] }
 0x164   :  { %v1259_v16 = vpop.f32.mrf.mxu2  ;;  %v3756_v51 = vld [vmem:[#allocation8 + $0x6ec] sm:$0xf] }
 0x165   :  { %v1272_v17 = vpop.f32.mrf.mxu3  ;;  %v1260_v19 = vadd.f32 %v1259_v16, %v1247_v11  ;;  %v3742_v11 = vld [vmem:[#allocation8 + $0x674] sm:$0xf0]  ;;  %v3227_v16 = vld [vmem:[#allocation8 + $0x5d8] sm:$0xf0]  ;;  %v3374_v59 = vor.u32 %v3756_v51, %v3371_v52  ;;  %v3784_v52 = vld [vmem:[#allocation8 + $0x7cc] sm:$0xf] }
 0x166   :  { %2226 = vmatpush.bf16.msrb.mxu0 %v3018_v3  ;;  %2235 = vmatpush.bf16.msrb.mxu1 %v3210_v4  ;;  %v3243_v3 = vld [vmem:[#allocation8 + $0x5f8] sm:$0xf0]  ;;  %v3230_v2 = vor.u32 %v3720_v15, %v3227_v16 }
 0x167   :  { %v1273_v28 = vadd.f32 %v1272_v17, %v1260_v19  ;;  %v3246_v10 = vor.u32 %v3724_v1, %v3243_v3  ;;  %v3306_v17 = vor.u32 %v3742_v11, %v3305_v9  ;;  %v3038_v19 = vor.u32 %v3672_v13, %v3035_v14  ;;  %v3163_v1 = vld [vmem:[#allocation8 + $0x558] sm:$0xf0]  ;;  %v3752_v3 = vld [vmem:[#allocation8 + $0x6cc] sm:$0xf]  ;;  %v3465_v9 = vld [vmem:[#allocation8 + $0x7a8] sm:$0xf] }
 0x168   :  { %v3700_v11 = vld [vmem:[#allocation8 + $0x52c] sm:$0xf]  ;;  %v3147_v13 = vld [vmem:[#allocation8 + $0x538] sm:$0xf0] }
 0x169   :  { %v1330_v33 = vmax.f32 %v1273_v28, 0.0  ;;  %v3748_v14 = vld [vmem:[#allocation8 + $0x6ac] sm:$0xf]  ;;  %v3339_v15 = vld [vmem:[#allocation8 + $0x6b8] sm:$0xf0] }
 0x16a   :  { %2227 = vmatpush.bf16.msrb.mxu0 %v3002_v20  ;;  %2236 = vmatpush.bf16.msrb.mxu1 %v3194_v21  ;;  %v3289_v20 = vld [vmem:[#allocation8 + $0x648] sm:$0xf] }
 0x16b   :  { %v4006_v38 = vpack.c.bf16 %v1330_v33, %v1330_v33  ;;  %v3290_v29 = vor.u32 %v3738_v22, %v3289_v20  ;;  %v3214_v33 = vor.u32 %v3716_v26, %v3211_v27  ;;  %v3778_v20 = vld [vmem:[#allocation8 + $0x794] sm:$0xf0]  ;;  %v3744_v22 = vld [vmem:[#allocation8 + $0x68c] sm:$0xf]  ;;  %v3433_v27 = vld [vmem:[#allocation8 + $0x768] sm:$0xf] }
 0x16c   :  { %v1261_v42 = vpop.f32.mrf.mxu2 }
 0x16d   :  { %v1274_v43 = vpop.f32.mrf.mxu3  ;;  %2189 = vmatmul.bf16.vlgmr.msra.gmra.mxu1 %v4001_v12  ;;  %2228 = vmatmul.bf16.vlgmr.msrb.gmra.mxu0 %v3998_v62 }
 0x16e   :  { %2272 = vmatpush.bf16.msra.mxu0 %v3118_v24  ;;  %2150 = vmatmul.bf16.vlgmr.msrb.gmra.mxu2 %v4006_v38  ;;  %v3019_v24 = vld [vmem:[#allocation8 + $0x438] sm:$0xf0]  ;;  %v3257_v43 = vld [vmem:[#allocation8 + $0x608] sm:$0xf] }
 0x16f   :  { %2237 = vmatpush.bf16.msrb.mxu1 %v3178_v49  ;;  %2246 = vmatpush.bf16.msrb.mxu2 %v3370_v34  ;;  %v3022_v30 = vor.u32 %v3668_v23, %v3019_v24  ;;  %v3734_v49 = vld [vmem:[#allocation8 + $0x634] sm:$0xf0]  ;;  %v3664_v34 = vld [vmem:[#allocation8 + $0x40c] sm:$0xf]  ;;  %v3323_v23 = vld [vmem:[#allocation8 + $0x698] sm:$0xf0] }
 0x170   :  { %v3274_v41 = vor.u32 %v3734_v49, %v3273_v31  ;;  %v3326_v26 = vor.u32 %v3744_v22, %v3323_v23  ;;  %v3770_v49 = vld [vmem:[#allocation8 + $0x754] sm:$0xf0] }
 0x172   :  { %2273 = vmatpush.bf16.msra.mxu0 %v3102_v54  ;;  %v3003_v54 = vld [vmem:[#allocation8 + $0x418] sm:$0xf0] }
 0x173   :  { %2238 = vmatpush.bf16.msrb.mxu1 %v3162_v44  ;;  %2247 = vmatpush.bf16.msrb.mxu2 %v3354_v45  ;;  %v3006_v42 = vor.u32 %v3664_v34, %v3003_v54  ;;  %v3730_v44 = vld [vmem:[#allocation8 + $0x614] sm:$0xf0]  ;;  %v3736_v34 = vld [vmem:[#allocation8 + $0x64c] sm:$0xf]  ;;  %v3291_v54 = vld [vmem:[#allocation8 + $0x658] sm:$0xf0] }
 0x176   :  { %2274 = vmatpush.bf16.msra.mxu0 %v3086_v46  ;;  %v3198_v46 = vor.u32 %v3712_v36, %v3195_v37  ;;  %v3294_v36 = vor.u32 %v3736_v34, %v3291_v54  ;;  %v3401_v37 = vld [vmem:[#allocation8 + $0x728] sm:$0xf] }
 0x177   :  { %v1285_v0 = vpop.f32.mrf.mxu0  ;;  %2239 = vmatpush.bf16.msrb.mxu1 %v3146_v53  ;;  %2248 = vmatpush.bf16.msrb.mxu2 %v3338_v55  ;;  %v3258_v55 = vor.u32 %v3730_v44, %v3257_v43  ;;  %v3385_v44 = vld [vmem:[#allocation8 + $0x708] sm:$0xf] }
 0x178   :  { %v1286_v21 = vadd.f32 %v1285_v0, %v475_v6  ;;  %v3482_v6 = vor.u32 %v3786_v61, %v3481_v60  ;;  %v3776_v60 = vld [vmem:[#allocation8 + $0x78c] sm:$0xf]  ;;  %v3451_v61 = vld [vmem:[#allocation8 + $0x798] sm:$0xf0] }
 0x17a   :  { %v1298_v4 = vpop.f32.mrf.mxu1  ;;  %2275 = vmatpush.bf16.msra.mxu0 %v3070_v56  ;;  %v3498_v56 = vor.u32 %v3790_v47, %v3497_v18  ;;  %v3259_v18 = vld [vmem:[#allocation8 + $0x618] sm:$0xf0]  ;;  %v3788_v47 = vld [vmem:[#allocation8 + $0x7ec] sm:$0xf] }
 0x17b   :  { %2240 = vmatpush.bf16.msrb.mxu1 %v3130_v5  ;;  %2249 = vmatpush.bf16.msrb.mxu2 %v3322_v7  ;;  %v1299_v32 = vadd.f32 %v1298_v4, %v1286_v21  ;;  %v3355_v4 = vld [vmem:[#allocation8 + $0x6d8] sm:$0xf0]  ;;  %v3166_v7 = vor.u32 %v3704_v63, %v3163_v1  ;;  %v3696_v21 = vld [vmem:[#allocation8 + $0x50c] sm:$0xf]  ;;  %v3502_v51 = vor.u32 %v3788_v47, %v3499_v48 }
 0x17c   :  { %v3454_v63 = vor.u32 %v3776_v60, %v3451_v61  ;;  %v3435_v1 = vld [vmem:[#allocation8 + $0x778] sm:$0xf0] }
 0x17e   :  { %2276 = vmatpush.bf16.msra.mxu0 %v3054_v8  ;;  %2241 = vmatmul.bf16.vlgmr.msrb.gmra.mxu1 %v4001_v12  ;;  %v3358_v8 = vor.u32 %v3752_v3, %v3355_v4  ;;  %v3768_v4 = vld [vmem:[#allocation8 + $0x74c] sm:$0xf] }
 0x17f   :  { %2285 = vmatpush.bf16.msra.mxu1 %v3246_v10  ;;  %v1287_v25 = vpop.f32.mrf.mxu0  ;;  %2202 = vmatmul.bf16.vlgmr.msra.gmra.mxu2 %v4006_v38  ;;  %v3782_v10 = vld [vmem:[#allocation8 + $0x7b4] sm:$0xf0] }
 0x180   :  { %2250 = vmatpush.bf16.msrb.mxu2 %v3306_v17  ;;  %v3466_v16 = vor.u32 %v3782_v10, %v3465_v9  ;;  %v3342_v17 = vor.u32 %v3748_v14, %v3339_v15  ;;  %v3760_v10 = vld [vmem:[#allocation8 + $0x70c] sm:$0xf] }
 0x182   :  { %v1300_v28 = vpop.f32.mrf.mxu1  ;;  %2277 = vmatpush.bf16.msra.mxu0 %v3038_v19  ;;  %v3449_v19 = vld [vmem:[#allocation8 + $0x788] sm:$0xf] }
 0x183   :  { %2286 = vmatpush.bf16.msra.mxu1 %v3230_v2  ;;  %v3131_v2 = vld [vmem:[#allocation8 + $0x518] sm:$0xf0]  ;;  %v3450_v24 = vor.u32 %v3778_v20, %v3449_v19  ;;  %v3774_v28 = vld [vmem:[#allocation8 + $0x774] sm:$0xf0] }
 0x184   :  { %v1311_v35 = vpop.f32.mrf.mxu2  ;;  %2251 = vmatpush.bf16.msrb.mxu2 %v3290_v29  ;;  %v3134_v25 = vor.u32 %v3696_v21, %v3131_v2  ;;  %v3740_v29 = vld [vmem:[#allocation8 + $0x66c] sm:$0xf]  ;;  %v3434_v31 = vor.u32 %v3774_v28, %v3433_v27 }
 0x185   :  { %v1312_v39 = vadd.f32 %v1311_v35, %v1299_v32  ;;  %v1324_v40 = vpop.f32.mrf.mxu3 }
 0x186   :  { %2278 = vmatpush.bf16.msra.mxu0 %v3022_v30  ;;  %v3307_v30 = vld [vmem:[#allocation8 + $0x678] sm:$0xf0] }
 0x187   :  { %v1325_v45 = vadd.f32 %v1324_v40, %v1312_v39  ;;  %2287 = vmatpush.bf16.msra.mxu1 %v3214_v33  ;;  %v3310_v32 = vor.u32 %v3740_v29, %v3307_v30  ;;  %v3417_v33 = vld [vmem:[#allocation8 + $0x748] sm:$0xf]  ;;  %v3766_v39 = vld [vmem:[#allocation8 + $0x734] sm:$0xf0]  ;;  %v3732_v40 = vld [vmem:[#allocation8 + $0x62c] sm:$0xf] }
 0x188   :  { %2252 = vmatpush.bf16.msrb.mxu2 %v3274_v41  ;;  %v3418_v35 = vor.u32 %v3770_v49, %v3417_v33  ;;  %v3275_v41 = vld [vmem:[#allocation8 + $0x638] sm:$0xf0] }
 0x189   :  { %v1331_v53 = vmax.f32 %v1325_v45, 0.0  ;;  %v3278_v43 = vor.u32 %v3732_v40, %v3275_v41  ;;  %v3762_v45 = vld [vmem:[#allocation8 + $0x714] sm:$0xf0] }
 0x18a   :  { %2279 = vmatpush.bf16.msra.mxu0 %v3006_v42  ;;  %v3402_v42 = vor.u32 %v3766_v39, %v3401_v37  ;;  %v3386_v50 = vor.u32 %v3762_v45, %v3385_v44 }
 0x18b   :  { %v4014_v57 = vpack.c.bf16 %v1331_v53, %v1331_v53  ;;  %2288 = vmatpush.bf16.msra.mxu1 %v3198_v46  ;;  %v3728_v46 = vld [vmem:[#allocation8 + $0x60c] sm:$0xf]  ;;  %v3483_v53 = vld [vmem:[#allocation8 + $0x7d8] sm:$0xf0] }
 0x18c   :  { %v1313_v0 = vpop.f32.mrf.mxu2  ;;  %2253 = vmatpush.bf16.msrb.mxu2 %v3258_v55  ;;  %v3486_v55 = vor.u32 %v3784_v52, %v3483_v53 }
 0x18d   :  { %v1326_v5 = vpop.f32.mrf.mxu3  ;;  %2163 = vmatmul.bf16.vlgmr.msrb.gmra.mxu3 %v4014_v57  ;;  %2280 = vmatmul.bf16.vlgmr.msra.gmra.mxu0 %v3998_v62  ;;  %v3150_v62 = vor.u32 %v3700_v11, %v3147_v13  ;;  %v3772_v0 = vld [vmem:[#allocation8 + $0x76c] sm:$0xf] }
 0x18e   :  { %2259 = vmatpush.bf16.msrb.mxu3 %v3498_v56  ;;  %v3780_v56 = vld [vmem:[#allocation8 + $0x7ac] sm:$0xf]  ;;  %v3438_v3 = vor.u32 %v3772_v0, %v3435_v1  ;;  %v3419_v5 = vld [vmem:[#allocation8 + $0x758] sm:$0xf0] }
 0x18f   :  { %2289 = vmatpush.bf16.msra.mxu1 %v3182_v58  ;;  %2254 = vmatmul.bf16.vlgmr.msrb.gmra.mxu2 %v4006_v38  ;;  %v3467_v58 = vld [vmem:[#allocation8 + $0x7b8] sm:$0xf0] }
 0x190   :  { %2298 = vmatpush.bf16.msra.mxu2 %v3374_v59  ;;  %v3470_v59 = vor.u32 %v3780_v56, %v3467_v58 }
 0x192   :  { %2260 = vmatpush.bf16.msrb.mxu3 %v3482_v6  ;;  %v3422_v6 = vor.u32 %v3768_v4, %v3419_v5 }
 0x193   :  { %2290 = vmatpush.bf16.msra.mxu1 %v3166_v7  ;;  %v3764_v7 = vld [vmem:[#allocation8 + $0x72c] sm:$0xf] }
 0x194   :  { %2299 = vmatpush.bf16.msra.mxu2 %v3358_v8  ;;  %v3403_v8 = vld [vmem:[#allocation8 + $0x738] sm:$0xf0] }
 0x195   :  { %v3406_v9 = vor.u32 %v3764_v7, %v3403_v8 }
 0x196   :  { %2261 = vmatpush.bf16.msrb.mxu3 %v3466_v16 }
 0x197   :  { %2291 = vmatpush.bf16.msra.mxu1 %v3150_v62 }
 0x198   :  { %2300 = vmatpush.bf16.msra.mxu2 %v3342_v17 }
 0x19a   :  { %2262 = vmatpush.bf16.msrb.mxu3 %v3450_v24 }
 0x19b   :  { %2292 = vmatpush.bf16.msra.mxu1 %v3134_v25  ;;  %v1466_v25 = vld [vmem:[#allocation7 + $0x2] ss:$4 sm:$0xf] }
 0x19c   :  { %2301 = vmatpush.bf16.msra.mxu2 %v3326_v26  ;;  %v1468_v28 = vperm.slane %v1466_v25, 0  ;;  %v1470_v47 = vperm.slane %v1466_v25, 2  ;;  %v1471_v60 = vperm.slane %v1466_v25, 3 }
 0x19d   :  { %2215 = vmatmul.bf16.vlgmr.msra.gmra.mxu3 %v4014_v57 }
 0x19e   :  { %2263 = vmatpush.bf16.msrb.mxu3 %v3434_v31  ;;  %2293 = vmatmul.bf16.vlgmr.msra.gmra.mxu1 %v4001_v12  ;;  %v3262_v12 = vor.u32 %v3728_v46, %v3259_v18 }
 0x1a0   :  { %2302 = vmatpush.bf16.msra.mxu2 %v3310_v32 }
 0x1a2   :  { %2264 = vmatpush.bf16.msrb.mxu3 %v3418_v35 }
 0x1a4   :  { %2303 = vmatpush.bf16.msra.mxu2 %v3294_v36  ;;  %v1469_v36 = vperm.slane %v1466_v25, 1 }
 0x1a6   :  { %2265 = vmatpush.bf16.msrb.mxu3 %v3402_v42 }
 0x1a8   :  { %2304 = vmatpush.bf16.msra.mxu2 %v3278_v43 }
 0x1aa   :  { %2266 = vmatpush.bf16.msrb.mxu3 %v3386_v50 }
 0x1ac   :  { %2305 = vmatpush.bf16.msra.mxu2 %v3262_v12 }
 0x1ad   :  { %2267 = vmatmul.bf16.vlgmr.msrb.gmra.mxu3 %v4014_v57 }
 0x1ae   :  { %2311 = vmatpush.bf16.msra.mxu3 %v3502_v51 }
 0x1af   :  { %2306 = vmatmul.bf16.vlgmr.msra.gmra.mxu2 %v4006_v38  ;;  %v3387_v38 = vld [vmem:[#allocation8 + $0x718] sm:$0xf0] }
 0x1b0   :  { %v3390_v11 = vor.u32 %v3760_v10, %v3387_v38 }
 0x1b2   :  { %2312 = vmatpush.bf16.msra.mxu3 %v3486_v55 }
 0x1b6   :  { %2313 = vmatpush.bf16.msra.mxu3 %v3470_v59 }
 0x1ba   :  { %2314 = vmatpush.bf16.msra.mxu3 %v3454_v63 }
 0x1be   :  { %2315 = vmatpush.bf16.msra.mxu3 %v3438_v3 }
 0x1c2   :  { %2316 = vmatpush.bf16.msra.mxu3 %v3422_v6 }
 0x1c6   :  { %2317 = vmatpush.bf16.msra.mxu3 %v3406_v9 }
 0x1ca   :  { %2318 = vmatpush.bf16.msra.mxu3 %v3390_v11  ;;  %v2125_v13 = vpop.f32.mrf.mxu0 }
 0x1cb   :  { %v2126_v30 = vadd.f32 %v2125_v13, %v1468_v28 }
 0x1cd   :  { %2319 = vmatmul.bf16.vlgmr.msra.gmra.mxu3 %v4014_v57 }
 0x1d2   :  { %v2127_v14 = vpop.f32.mrf.mxu0 }
 0x1da   :  { %v2138_v15 = vpop.f32.mrf.mxu1  ;;  %v2177_v16 = vpop.f32.mrf.mxu0 }
 0x1db   :  { %v2139_v31 = vadd.f32 %v2138_v15, %v2126_v30  ;;  %v2178_v39 = vadd.f32 %v2177_v16, %v1469_v36 }
 0x1e2   :  { %v2140_v62 = vpop.f32.mrf.mxu1  ;;  %v2179_v17 = vpop.f32.mrf.mxu0 }
 0x1ea   :  { %v2190_v19 = vpop.f32.mrf.mxu1  ;;  %v2229_v20 = vpop.f32.mrf.mxu0 }
 0x1eb   :  { %v2191_v42 = vadd.f32 %v2190_v19, %v2178_v39  ;;  %v2230_v50 = vadd.f32 %v2229_v20, %v1470_v47 }
 0x1f1   :  { %v2151_v21 = vpop.f32.mrf.mxu2 }
 0x1f2   :  { %v2192_v2 = vpop.f32.mrf.mxu1  ;;  %v2231_v22 = vpop.f32.mrf.mxu0  ;;  %v2152_v32 = vadd.f32 %v2151_v21, %v2139_v31 }
 0x1f9   :  { %v2153_v23 = vpop.f32.mrf.mxu2 }
 0x1fb   :  { %v2242_v24 = vpop.f32.mrf.mxu1 }
 0x1fc   :  { %v2243_v12 = vadd.f32 %v2242_v24, %v2230_v50 }
 0x202   :  { %v2203_v26 = vpop.f32.mrf.mxu2 }
 0x203   :  { %v2244_v27 = vpop.f32.mrf.mxu1  ;;  %v2204_v43 = vadd.f32 %v2203_v26, %v2191_v42 }
 0x20a   :  { %v2281_v29 = vpop.f32.mrf.mxu0  ;;  %v2205_v57 = vpop.f32.mrf.mxu2 }
 0x20b   :  { %v2282_v61 = vadd.f32 %v2281_v29, %v1471_v60 }
 0x210   :  { %v2164_v33 = vpop.f32.mrf.mxu3 }
 0x211   :  { %v2165_v49 = vadd.f32 %v2164_v33, %v2152_v32 }
 0x212   :  { %v2283_v34 = vpop.f32.mrf.mxu0  ;;  %v2255_v35 = vpop.f32.mrf.mxu2 }
 0x213   :  { %v2324_v54 = vmax.f32 %v2165_v49, 0.0  ;;  %v2256_v51 = vadd.f32 %v2255_v35, %v2243_v12 }
 0x215   :  { %2328 = vst [vmem:[#allocation10] sm:$0xff] %v2324_v54 }
 0x218   :  { %v2166_v37 = vpop.f32.mrf.mxu3 }
 0x21a   :  { %v2257_v41 = vpop.f32.mrf.mxu2 }
 0x21b   :  { %v2294_v40 = vpop.f32.mrf.mxu1 }
 0x21c   :  { %v2295_v63 = vadd.f32 %v2294_v40, %v2282_v61 }
 0x220   :  { %v2216_v44 = vpop.f32.mrf.mxu3 }
 0x221   :  { %v2217_v45 = vadd.f32 %v2216_v44, %v2204_v43 }
 0x223   :  { %v2325_v46 = vmax.f32 %v2217_v45, 0.0  ;;  %v2296_v18 = vpop.f32.mrf.mxu1 }
 0x225   :  { %2329 = vst [vmem:[#allocation10 + $0x8] sm:$0xff] %v2325_v46 }
 0x228   :  { %v2218_v48 = vpop.f32.mrf.mxu3 }
 0x230   :  { %v2268_v52 = vpop.f32.mrf.mxu3 }
 0x231   :  { %v2269_v53 = vadd.f32 %v2268_v52, %v2256_v51 }
 0x232   :  { %v2307_v55 = vpop.f32.mrf.mxu2 }
 0x233   :  { %v2326_v56 = vmax.f32 %v2269_v53, 0.0  ;;  %v2308_v0 = vadd.f32 %v2307_v55, %v2295_v63 }
 0x235   :  { %2330 = vst [vmem:[#allocation10 + $0x10] sm:$0xff] %v2326_v56 }
 0x238   :  { %v2270_v58 = vpop.f32.mrf.mxu3 }
 0x23a   :  { %v2309_v59 = vpop.f32.mrf.mxu2 }
 0x250   :  { %v2320_v1 = vpop.f32.mrf.mxu3 }
 0x251   :  { %v2321_v3 = vadd.f32 %v2320_v1, %v2308_v0 }
 0x253   :  { %v2327_v4 = vmax.f32 %v2321_v3, 0.0 }
 0x255   :  { %2331 = vst [vmem:[#allocation10 + $0x18] sm:$0xff] %v2327_v4 }
 0x256   :  { %2342 = dma.vmem_to_hbm [thread:$0]  %s2338_s3, 512, %s2340_s11, [#allocation4]  }
 0x258   :  { %v2322_v5 = vpop.f32.mrf.mxu3 }
 0x259   :  { %3924 = dma.done.wait [#allocation4], 512  }
 0x25a   :  { %3925 = vsyncadd [#allocation4], 4294966784 }
 0x25b   :  { %2347 = vsyncpa [#allocation3], 1 }
 0x25c   :  { %2348 = vsyncpa [#allocation6], 1 }
 0x25d   :  { %2349 = vsyncpa [#allocation9], 1 }
 0x25e   :  { %2350 = vsyncpa [#allocation4], 1 }

</bundles_post_ra>
